<compile_context>
chip_gen: v7x
topology: tpu7x:2x2x1
jax: 0.10.0
libtpu: 0.0.40
codegen_flags: <defaults>
</compile_context>

<pallas_src>
import functools

import jax
import jax.numpy as jnp
from jax import lax
from jax.experimental import pallas as pl
from jax.experimental.pallas import tpu as pltpu

_EPS = 1e-5


def _round_up(n, m):
    return (n + m - 1) // m * m


def _vmem_capacity_bytes():
    try:
        return int(pltpu.get_tpu_info().vmem_capacity_bytes)
    except Exception:
        return 64 * 1024 * 1024          # conservative fallback (v7x per-core VMEM)


def _vmem_limit(est_bytes, cap):
    # >= estimate (+25% headroom), never below 32 MiB, never above 3/4 of physical.
    return int(min(cap * 3 // 4, max(32 * 1024 * 1024, est_bytes * 5 // 4 + (2 << 20))))


def _choose_tiles(B, D, out_dim, x_bytes, out_bytes, budget):
    """Generation-aware tile sizes from a VMEM byte budget."""
    # --- phase 2 K tile: the (tk, out) bf16 weight block is double-buffered and
    #     never batch-tiled, so size it first.
    if 2 * D * out_dim * 2 <= budget // 2:
        tk = D                                          # whole reduction dim, nk == 1
    else:
        tk = (budget // 2) // (2 * out_dim * 2) // 128 * 128
        tk = max(128, min(tk, _round_up(D, 128)))
    nk = pl.cdiv(D, tk)

    # --- phase 2 batch tile: 2x x-tile + 2x out-tile + f32 acc scratch per row.
    fixed2 = 2 * tk * out_dim * 2 + 4 * tk * 4 + 2 * out_dim * 4
    per_row2 = 2 * tk * x_bytes + 2 * out_dim * out_bytes + out_dim * 4
    tb2 = max(8, min(max(budget - fixed2, 0) // per_row2, 8192) // 8 * 8)
    tb2 = max(8, min(tb2, _round_up(B, 8)))

    # --- phase 1 batch tile: full feature rows + two resident (1,8,D) f32 partials.
    fixed1 = 2 * 2 * 8 * D * 4
    per_row1 = 2 * D * x_bytes
    tb1 = max(8, min(max(budget - fixed1, 0) // per_row1, 8192) // 8 * 8)
    tb1 = max(8, min(tb1, _round_up(B, 8)))
    return tb1, tb2, tk, nk


# ---------------------------------------------------------------------------
# Phase 1: per-core partial batch statistics (sum, sum of squares)
# ---------------------------------------------------------------------------
def _bn_stats_kernel(x_ref, sum_ref, sq_ref, *, batch, tile_b, half, mask_rows):
    j = pl.program_id(1)

    @pl.when(j == 0)
    def _():
        sum_ref[...] = jnp.zeros_like(sum_ref)
        sq_ref[...] = jnp.zeros_like(sq_ref)

    x = x_ref[...].astype(jnp.float32)                        # (TB, D), f32 VPU math
    if mask_rows:                                             # static: ragged/duplicate tiles
        t = pl.program_id(0) * half + j                       # logical batch-tile id
        rows = t * tile_b + lax.broadcasted_iota(jnp.int32, (tile_b, 1), 0)
        x = jnp.where(rows < batch, x, 0.0)

    # Batch reduction on the MXU (keeps VPU/XLU slots free); all 8 accumulator
    # rows hold the same per-feature sums.
    ones = jnp.ones((8, tile_b), jnp.float32)
    sum_ref[...] += jnp.dot(ones, x, preferred_element_type=jnp.float32)[None]
    sq_ref[...] += jnp.dot(ones, x * x, preferred_element_type=jnp.float32)[None]
    # TODO(synk): for very small D (<128) the stats pass could pack k=128/D rows
    # per 128-lane vreg for better DMA/lane occupancy.


# ---------------------------------------------------------------------------
# Phase 2: normalize + Linear (bf16 MXU, f32 acc, K-tiled) + bias + SiLU
# ---------------------------------------------------------------------------
def _bn_linear_silu_kernel(x_ref, scale_ref, shift_ref, w_ref, b_ref, o_ref,
                           acc_ref, *, dim, tile_k):
    k = pl.program_id(1)

    @pl.when(k == 0)
    def _():
        acc_ref[...] = jnp.zeros_like(acc_ref)

    x = x_ref[...].astype(jnp.float32)                        # (TB, TK)
    y = x * scale_ref[...] + shift_ref[...]                   # fused BN affine, f32 VPU
    # TODO(synk): training-mode stochastic Dropout omitted (identity / eval semantics).
    w = w_ref[...]                                            # (TK, OUT) bf16
    if dim % tile_k != 0:                                     # static: ragged last K block
        col = k * tile_k + lax.broadcasted_iota(jnp.int32, (1, tile_k), 1)
        y = jnp.where(col < dim, y, 0.0)
        row = k * tile_k + lax.broadcasted_iota(jnp.int32, (tile_k, 1), 0)
        w = jnp.where(row < dim, w, jnp.zeros_like(w))

    acc_ref[...] += jnp.dot(y.astype(jnp.bfloat16), w,        # bf16 MXU, f32 acc
                            preferred_element_type=jnp.float32)

    @pl.when(k == pl.num_programs(1) - 1)
    def _():
        z = acc_ref[...] + b_ref[...]
        o_ref[...] = (z * jax.nn.sigmoid(z)).astype(o_ref.dtype)   # SiLU


# ---------------------------------------------------------------------------
# One-time parameter preparation (hoisted out of the hot path)
# ---------------------------------------------------------------------------
def prepare_params(gamma, beta, weight, bias):
    """gamma/beta: (D,); weight: (out, D) PyTorch layout; bias: (out,)."""
    dim = gamma.shape[0]
    out_dim = weight.shape[0]
    return dict(
        gamma=gamma.reshape(1, dim).astype(jnp.float32),
        beta=beta.reshape(1, dim).astype(jnp.float32),
        w_t=jnp.asarray(weight).T.astype(jnp.bfloat16),       # (dim, out_dim), no lane pad
        b=bias.reshape(1, out_dim).astype(jnp.float32),
    )


@jax.jit
def residual_mlp_downsample(x, gamma2, beta2, w_t, b_p):
    """x: (B, D); gamma2/beta2: (1, D) f32; w_t: (D, out) bf16; b_p: (1, out) f32."""
    B, D = x.shape
    out_dim = w_t.shape[1]
    x_bytes = jnp.dtype(x.dtype).itemsize
    out_bytes = x_bytes

    cap = _vmem_capacity_bytes()
    budget = cap // 2                                         # pipeline/compiler headroom
    tb1, tb2, tk, nk = _choose_tiles(B, D, out_dim, x_bytes, out_bytes, budget)

    # ---------------- phase 1: per-core partial sum / sumsq ----------------
    nbt1 = pl.cdiv(B, tb1)
    half = pl.cdiv(nbt1, 2)                                   # batch tiles per TensorCore
    mask_rows = (2 * half * tb1) != B

    est1 = 2 * tb1 * D * x_bytes + 2 * 2 * 8 * D * 4
    sums, sqs = pl.pallas_call(
        functools.partial(_bn_stats_kernel, batch=B, tile_b=tb1, half=half,
                          mask_rows=mask_rows),
        out_shape=(jax.ShapeDtypeStruct((2, 8, D), jnp.float32),
                   jax.ShapeDtypeStruct((2, 8, D), jnp.float32)),
        grid_spec=pltpu.PrefetchScalarGridSpec(
            num_scalar_prefetch=0,
            grid=(2, half),
            in_specs=[pl.BlockSpec(
                (tb1, D), lambda c, j: (jnp.minimum(c * half + j, nbt1 - 1), 0))],
            out_specs=[pl.BlockSpec((1, 8, D), lambda c, j: (c, 0, 0)),
                       pl.BlockSpec((1, 8, D), lambda c, j: (c, 0, 0))]),
        compiler_params=pltpu.CompilerParams(
            dimension_semantics=("parallel", "arbitrary"),
            vmem_limit_bytes=_vmem_limit(est1, cap)),
    )(x)

    # ---- tiny XLA epilogue: combine the two per-core partials, fold BN affine ----
    total = sums[:, 0, :].sum(axis=0, keepdims=True)          # (1, D)
    total_sq = sqs[:, 0, :].sum(axis=0, keepdims=True)
    inv_b = jnp.float32(1.0 / B)
    mean = total * inv_b
    var = total_sq * inv_b - mean * mean                      # biased (training) variance
    rstd = lax.rsqrt(jnp.maximum(var, 0.0) + _EPS)
    scale = gamma2 * rstd                                     # y = x*scale + shift
    shift = beta2 - mean * scale
    # TODO(synk): running_mean / running_var state update (not part of forward output).

    # ---------------- phase 2: normalize + matmul + bias + SiLU ----------------
    nbt2 = pl.cdiv(B, tb2)
    est2 = (2 * tb2 * tk * x_bytes + 2 * tb2 * out_dim * out_bytes
            + tb2 * out_dim * 4 + 2 * tk * out_dim * 2 + 4 * tk * 4 + 2 * out_dim * 4)
    out = pl.pallas_call(
        functools.partial(_bn_linear_silu_kernel, dim=D, tile_k=tk),
        out_shape=jax.ShapeDtypeStruct((B, out_dim), x.dtype),
        grid_spec=pltpu.PrefetchScalarGridSpec(
            num_scalar_prefetch=0,
            grid=(nbt2, nk),
            in_specs=[pl.BlockSpec((tb2, tk), lambda i, k: (i, k)),
                      pl.BlockSpec((1, tk), lambda i, k: (0, k)),
                      pl.BlockSpec((1, tk), lambda i, k: (0, k)),
                      pl.BlockSpec((tk, out_dim), lambda i, k: (k, 0)),
                      pl.BlockSpec((1, out_dim), lambda i, k: (0, 0))],
            out_specs=pl.BlockSpec((tb2, out_dim), lambda i, k: (i, 0)),
            scratch_shapes=[pltpu.VMEM((tb2, out_dim), jnp.float32)]),
        compiler_params=pltpu.CompilerParams(
            dimension_semantics=("parallel", "arbitrary"),
            vmem_limit_bytes=_vmem_limit(est2, cap)),
    )(x, scale, shift, w_t, b_p)

    return out


if __name__ == "__main__":
    key = jax.random.PRNGKey(0)
    k_x, k_w, k_b = jax.random.split(key, 3)

    batch, dim, downsample_dim = 256, 32, 16

    x = jax.random.normal(k_x, (batch, dim), dtype=jnp.float32)

    # Deterministic parameter init (PyTorch __init__ shapes).
    gamma = jnp.ones((dim,), jnp.float32)                     # BatchNorm1d.weight
    beta = jnp.zeros((dim,), jnp.float32)                     # BatchNorm1d.bias
    bound = 1.0 / float(dim) ** 0.5
    weight = jax.random.uniform(k_w, (downsample_dim, dim), jnp.float32, -bound, bound)
    bias = jax.random.uniform(k_b, (downsample_dim,), jnp.float32, -bound, bound)

    params = prepare_params(gamma, beta, weight, bias)
    out = residual_mlp_downsample(
        x, params["gamma"], params["beta"], params["w_t"], params["b"])
    out = jax.block_until_ready(out)

    # Pure-JAX reference: BN (training batch stats), dropout=identity, Linear, SiLU.
    mean = jnp.mean(x, axis=0, keepdims=True)
    var = jnp.mean(x * x, axis=0, keepdims=True) - mean * mean
    y = (x - mean) * jax.lax.rsqrt(var + _EPS) * gamma + beta
    z = y @ weight.T + bias
    ref = z * jax.nn.sigmoid(z)

    assert out.shape == (batch, downsample_dim)
    assert bool(jnp.all(jnp.isfinite(out)))
    assert jnp.allclose(out, ref, atol=5e-2, rtol=5e-2), float(jnp.max(jnp.abs(out - ref)))
    print("KERNEL_OK")
</pallas_src>

<mosaic_0001>
module attributes {stable_mosaic.version = 11 : i64} {
  func.func @_bn_stats_kernel(%arg0: i32, %arg1: i32, %arg2: memref<256x32xf32, #tpu.memory_space<vmem>>, %arg3: memref<1x8x32xf32, #tpu.memory_space<vmem>>, %arg4: memref<1x8x32xf32, #tpu.memory_space<vmem>>) attributes {dimension_semantics = [#tpu.dimension_semantics<parallel>, #tpu.dimension_semantics<arbitrary>], iteration_bounds = array<i64: 2, 1>, scalar_prefetch = 0 : i64, scratch_operands = 0 : i64, tpu.core_type = #tpu.core_type<tc>, window_params = [{transform_indices = @transform_0, window_bounds = array<i64: 256, 32>}, {transform_indices = @transform_1, window_bounds = array<i64: 1, 8, 32>}, {transform_indices = @transform_2, window_bounds = array<i64: 1, 8, 32>}]} {
    %c0_i32 = arith.constant 0 : i32
    %0 = arith.cmpi eq, %arg1, %c0_i32 : i32
    %1 = arith.extui %0 : i1 to i32
    %c0_i32_0 = arith.constant 0 : i32
    %2 = arith.cmpi ne, %1, %c0_i32_0 : i32
    scf.if %2 {
      %cst_18 = arith.constant 0.000000e+00 : f32
      %28 = vector.broadcast %cst_18 : f32 to vector<1x8x32xf32>
      %c0_19 = arith.constant 0 : index
      %c0_20 = arith.constant 0 : index
      %c0_21 = arith.constant 0 : index
      %29 = vector.load %arg3[%c0_19, %c0_20, %c0_21] : memref<1x8x32xf32, #tpu.memory_space<vmem>>, vector<1x8x32xf32>
      tpu.vector_store %arg3[%c0_19, %c0_20, %c0_21], %28 {strides = array<i32>} : memref<1x8x32xf32, #tpu.memory_space<vmem>>, vector<1x8x32xf32>,
      %cst_22 = arith.constant 0.000000e+00 : f32
      %30 = vector.broadcast %cst_22 : f32 to vector<1x8x32xf32>
      %c0_23 = arith.constant 0 : index
      %c0_24 = arith.constant 0 : index
      %c0_25 = arith.constant 0 : index
      %31 = vector.load %arg4[%c0_23, %c0_24, %c0_25] : memref<1x8x32xf32, #tpu.memory_space<vmem>>, vector<1x8x32xf32>
      tpu.vector_store %arg4[%c0_23, %c0_24, %c0_25], %30 {strides = array<i32>} : memref<1x8x32xf32, #tpu.memory_space<vmem>>, vector<1x8x32xf32>,
    } else {
    }
    %c0 = arith.constant 0 : index
    %c0_1 = arith.constant 0 : index
    %3 = vector.load %arg2[%c0, %c0_1] : memref<256x32xf32, #tpu.memory_space<vmem>>, vector<256x32xf32>
    %c1_i32 = arith.constant 1 : i32
    %4 = arith.muli %arg0, %c1_i32 : i32
    %5 = arith.addi %4, %arg1 : i32
    %c256_i32 = arith.constant 256 : i32
    %6 = arith.muli %5, %c256_i32 : i32
    %7 = tpu.iota {dimensions = array<i32: 0>} : vector<256x1xi32>
    %8 = vector.broadcast %6 : i32 to vector<256x1xi32>
    %9 = arith.addi %8, %7 : vector<256x1xi32>
    %c256_i32_2 = arith.constant 256 : i32
    %10 = vector.broadcast %c256_i32_2 : i32 to vector<256x1xi32>
    %11 = arith.cmpi slt, %9, %10 : vector<256x1xi32>
    %cst = arith.constant 0.000000e+00 : f32
    %12 = vector.shape_cast %11 : vector<256x1xi1> to vector<256x1xi1>
    %13 = vector.broadcast %12 : vector<256x1xi1> to vector<256x32xi1>
    %14 = vector.broadcast %cst : f32 to vector<256x32xf32>
    %15 = arith.select %13, %3, %14 : vector<256x32xi1>, vector<256x32xf32>
    %cst_3 = arith.constant 1.000000e+00 : f32
    %16 = vector.broadcast %cst_3 : f32 to vector<8x256xf32>
    %c0_4 = arith.constant 0 : index
    %c0_5 = arith.constant 0 : index
    %c0_6 = arith.constant 0 : index
    %17 = vector.load %arg3[%c0_4, %c0_5, %c0_6] : memref<1x8x32xf32, #tpu.memory_space<vmem>>, vector<1x8x32xf32>
    %cst_7 = arith.constant dense<0.000000e+00> : vector<8x32xf32>
    %18 = tpu.matmul %16, %15, %cst_7 {dimension_numbers = #tpu.dot_dimension_numbers<[1], [0], [0], [1], [0, 0, 1, 1], [], []>} : vector<8x256xf32>, vector<256x32xf32>, vector<8x32xf32> -> vector<8x32xf32>
    %19 = vector.shape_cast %18 : vector<8x32xf32> to vector<1x8x32xf32>
    %20 = arith.addf %17, %19 : vector<1x8x32xf32>
    %c0_8 = arith.constant 0 : index
    %c0_9 = arith.constant 0 : index
    %c0_10 = arith.constant 0 : index
    %21 = vector.load %arg3[%c0_8, %c0_9, %c0_10] : memref<1x8x32xf32, #tpu.memory_space<vmem>>, vector<1x8x32xf32>
    tpu.vector_store %arg3[%c0_8, %c0_9, %c0_10], %20 {strides = array<i32>} : memref<1x8x32xf32, #tpu.memory_space<vmem>>, vector<1x8x32xf32>,
    %c0_11 = arith.constant 0 : index
    %c0_12 = arith.constant 0 : index
    %c0_13 = arith.constant 0 : index
    %22 = vector.load %arg4[%c0_11, %c0_12, %c0_13] : memref<1x8x32xf32, #tpu.memory_space<vmem>>, vector<1x8x32xf32>
    %23 = arith.mulf %15, %15 : vector<256x32xf32>
    %cst_14 = arith.constant dense<0.000000e+00> : vector<8x32xf32>
    %24 = tpu.matmul %16, %23, %cst_14 {dimension_numbers = #tpu.dot_dimension_numbers<[1], [0], [0], [1], [0, 0, 1, 1], [], []>} : vector<8x256xf32>, vector<256x32xf32>, vector<8x32xf32> -> vector<8x32xf32>
    %25 = vector.shape_cast %24 : vector<8x32xf32> to vector<1x8x32xf32>
    %26 = arith.addf %22, %25 : vector<1x8x32xf32>
    %c0_15 = arith.constant 0 : index
    %c0_16 = arith.constant 0 : index
    %c0_17 = arith.constant 0 : index
    %27 = vector.load %arg4[%c0_15, %c0_16, %c0_17] : memref<1x8x32xf32, #tpu.memory_space<vmem>>, vector<1x8x32xf32>
    tpu.vector_store %arg4[%c0_15, %c0_16, %c0_17], %26 {strides = array<i32>} : memref<1x8x32xf32, #tpu.memory_space<vmem>>, vector<1x8x32xf32>,
    return
  }
  func.func @transform_0(%arg0: i32, %arg1: i32) -> (i32, i32) {
    %c1_i32 = arith.constant 1 : i32
    %0 = arith.muli %arg0, %c1_i32 : i32
    %1 = arith.addi %0, %arg1 : i32
    %c0_i32 = arith.constant 0 : i32
    %2 = arith.minsi %1, %c0_i32 : i32
    %c0_i32_0 = arith.constant 0 : i32
    %c0_i32_1 = arith.constant 0 : i32
    return %2, %c0_i32_0 : i32, i32
  }
  func.func @transform_1(%arg0: i32, %arg1: i32) -> (i32, i32, i32) {
    %c0_i32 = arith.constant 0 : i32
    %c0_i32_0 = arith.constant 0 : i32
    %c0_i32_1 = arith.constant 0 : i32
    return %arg0, %c0_i32, %c0_i32_0 : i32, i32, i32
  }
  func.func @transform_2(%arg0: i32, %arg1: i32) -> (i32, i32, i32) {
    %c0_i32 = arith.constant 0 : i32
    %c0_i32_0 = arith.constant 0 : i32
    %c0_i32_1 = arith.constant 0 : i32
    return %arg0, %c0_i32, %c0_i32_0 : i32, i32, i32
  }
}

module attributes {stable_mosaic.version = 11 : i64} {
  func.func @_bn_linear_silu_kernel(%arg0: i32, %arg1: i32, %arg2: memref<256x32xf32, #tpu.memory_space<vmem>>, %arg3: memref<1x32xf32, #tpu.memory_space<vmem>>, %arg4: memref<1x32xf32, #tpu.memory_space<vmem>>, %arg5: memref<32x16xbf16, #tpu.memory_space<vmem>>, %arg6: memref<1x16xf32, #tpu.memory_space<vmem>>, %arg7: memref<256x16xf32, #tpu.memory_space<vmem>>, %arg8: memref<256x16xf32, #tpu.memory_space<vmem>>) attributes {dimension_semantics = [#tpu.dimension_semantics<parallel>, #tpu.dimension_semantics<arbitrary>], iteration_bounds = array<i64: 1, 1>, scalar_prefetch = 0 : i64, scratch_operands = 1 : i64, tpu.core_type = #tpu.core_type<tc>, window_params = [{transform_indices = @transform_0, window_bounds = array<i64: 256, 32>}, {transform_indices = @transform_1, window_bounds = array<i64: 1, 32>}, {transform_indices = @transform_2, window_bounds = array<i64: 1, 32>}, {transform_indices = @transform_3, window_bounds = array<i64: 32, 16>}, {pipeline_mode = #tpu.pipeline_mode<synchronous>, transform_indices = @transform_4, window_bounds = array<i64: 1, 16>}, {transform_indices = @transform_5, window_bounds = array<i64: 256, 16>}]} {
    %c0_i32 = arith.constant 0 : i32
    %0 = arith.cmpi eq, %arg1, %c0_i32 : i32
    %1 = arith.extui %0 : i1 to i32
    %c0_i32_0 = arith.constant 0 : i32
    %2 = arith.cmpi ne, %1, %c0_i32_0 : i32
    scf.if %2 {
      %cst_14 = arith.constant 0.000000e+00 : f32
      %19 = vector.broadcast %cst_14 : f32 to vector<256x16xf32>
      %c0_15 = arith.constant 0 : index
      %c0_16 = arith.constant 0 : index
      %20 = vector.load %arg8[%c0_15, %c0_16] : memref<256x16xf32, #tpu.memory_space<vmem>>, vector<256x16xf32>
      tpu.vector_store %arg8[%c0_15, %c0_16], %19 {strides = array<i32>} : memref<256x16xf32, #tpu.memory_space<vmem>>, vector<256x16xf32>,
    } else {
    }
    %c0 = arith.constant 0 : index
    %c0_1 = arith.constant 0 : index
    %3 = vector.load %arg2[%c0, %c0_1] : memref<256x32xf32, #tpu.memory_space<vmem>>, vector<256x32xf32>
    %c0_2 = arith.constant 0 : index
    %c0_3 = arith.constant 0 : index
    %4 = vector.load %arg3[%c0_2, %c0_3] : memref<1x32xf32, #tpu.memory_space<vmem>>, vector<1x32xf32>
    %5 = vector.broadcast %4 : vector<1x32xf32> to vector<256x32xf32>
    %6 = arith.mulf %3, %5 : vector<256x32xf32>
    %c0_4 = arith.constant 0 : index
    %c0_5 = arith.constant 0 : index
    %7 = vector.load %arg4[%c0_4, %c0_5] : memref<1x32xf32, #tpu.memory_space<vmem>>, vector<1x32xf32>
    %8 = vector.broadcast %7 : vector<1x32xf32> to vector<256x32xf32>
    %9 = arith.addf %6, %8 : vector<256x32xf32>
    %c0_6 = arith.constant 0 : index
    %c0_7 = arith.constant 0 : index
    %10 = vector.load %arg5[%c0_6, %c0_7] : memref<32x16xbf16, #tpu.memory_space<vmem>>, vector<32x16xbf16>
    %c0_8 = arith.constant 0 : index
    %c0_9 = arith.constant 0 : index
    %11 = vector.load %arg8[%c0_8, %c0_9] : memref<256x16xf32, #tpu.memory_space<vmem>>, vector<256x16xf32>
    %12 = arith.truncf %9 : vector<256x32xf32> to vector<256x32xbf16>
    %cst = arith.constant dense<0.000000e+00> : vector<256x16xf32>
    %13 = tpu.matmul %12, %10, %cst {dimension_numbers = #tpu.dot_dimension_numbers<[1], [0], [0], [1], [0, 0, 1, 1], [], []>} : vector<256x32xbf16>, vector<32x16xbf16>, vector<256x16xf32> -> vector<256x16xf32>
    %14 = arith.addf %11, %13 : vector<256x16xf32>
    %c0_10 = arith.constant 0 : index
    %c0_11 = arith.constant 0 : index
    %15 = vector.load %arg8[%c0_10, %c0_11] : memref<256x16xf32, #tpu.memory_space<vmem>>, vector<256x16xf32>
    tpu.vector_store %arg8[%c0_10, %c0_11], %14 {strides = array<i32>} : memref<256x16xf32, #tpu.memory_space<vmem>>, vector<256x16xf32>,
    %c0_i32_12 = arith.constant 0 : i32
    %16 = arith.cmpi eq, %arg1, %c0_i32_12 : i32
    %17 = arith.extui %16 : i1 to i32
    %c0_i32_13 = arith.constant 0 : i32
    %18 = arith.cmpi ne, %17, %c0_i32_13 : i32
    scf.if %18 {
      %c0_14 = arith.constant 0 : index
      %c0_15 = arith.constant 0 : index
      %19 = vector.load %arg8[%c0_14, %c0_15] : memref<256x16xf32, #tpu.memory_space<vmem>>, vector<256x16xf32>
      %c0_16 = arith.constant 0 : index
      %c0_17 = arith.constant 0 : index
      %20 = vector.load %arg6[%c0_16, %c0_17] : memref<1x16xf32, #tpu.memory_space<vmem>>, vector<1x16xf32>
      %21 = vector.broadcast %20 : vector<1x16xf32> to vector<256x16xf32>
      %22 = arith.addf %19, %21 : vector<256x16xf32>
      %23 = arith.negf %22 : vector<256x16xf32>
      %24 = math.exp %23 : vector<256x16xf32>
      %cst_18 = arith.constant 1.000000e+00 : f32
      %25 = vector.broadcast %cst_18 : f32 to vector<256x16xf32>
      %26 = arith.addf %25, %24 : vector<256x16xf32>
      %27 = arith.divf %25, %26 : vector<256x16xf32>
      %28 = arith.mulf %22, %27 : vector<256x16xf32>
      %c0_19 = arith.constant 0 : index
      %c0_20 = arith.constant 0 : index
      %29 = vector.load %arg7[%c0_19, %c0_20] : memref<256x16xf32, #tpu.memory_space<vmem>>, vector<256x16xf32>
      tpu.vector_store %arg7[%c0_19, %c0_20], %28 {strides = array<i32>} : memref<256x16xf32, #tpu.memory_space<vmem>>, vector<256x16xf32>,
    } else {
    }
    return
  }
  func.func @transform_0(%arg0: i32, %arg1: i32) -> (i32, i32) {
    %c0_i32 = arith.constant 0 : i32
    return %arg0, %arg1 : i32, i32
  }
  func.func @transform_1(%arg0: i32, %arg1: i32) -> (i32, i32) {
    %c0_i32 = arith.constant 0 : i32
    %c0_i32_0 = arith.constant 0 : i32
    return %c0_i32, %arg1 : i32, i32
  }
  func.func @transform_2(%arg0: i32, %arg1: i32) -> (i32, i32) {
    %c0_i32 = arith.constant 0 : i32
    %c0_i32_0 = arith.constant 0 : i32
    return %c0_i32, %arg1 : i32, i32
  }
  func.func @transform_3(%arg0: i32, %arg1: i32) -> (i32, i32) {
    %c0_i32 = arith.constant 0 : i32
    %c0_i32_0 = arith.constant 0 : i32
    return %arg1, %c0_i32 : i32, i32
  }
  func.func @transform_4(%arg0: i32, %arg1: i32) -> (i32, i32) {
    %c0_i32 = arith.constant 0 : i32
    %c0_i32_0 = arith.constant 0 : i32
    %c0_i32_1 = arith.constant 0 : i32
    return %c0_i32, %c0_i32_0 : i32, i32
  }
  func.func @transform_5(%arg0: i32, %arg1: i32) -> (i32, i32) {
    %c0_i32 = arith.constant 0 : i32
    %c0_i32_0 = arith.constant 0 : i32
    return %arg0, %c0_i32 : i32, i32
  }
}

</mosaic_0001>

<bundles_post_ra>
// kernel: residual_mlp_downsample.2
= control target key start
LH: loop header
LB: loop body
LE: loop exit
PB: predicated region body
PF: predicated region fallthrough
CT: control target
= control target key end

     0   :  { %s955_s9 = smov 0   ;;  %s957_s10 = smov 0   ;;  %s1141_s0 = inlined_call_operand.vmem [shape: f32[256,32], index: 0, kind: input, shape index: {}]   ;;  %s1142_s1 = inlined_call_operand.vmem [shape: f32[2,8,32], index: 1, kind: output, shape index: {0}]   ;;  %s1143_s2 = inlined_call_operand.vmem [shape: f32[2,8,32], index: 2, kind: output, shape index: {1}]  }
   0x1   :  { %s959_s11 = smov 0  }
   0x2 LB: > { %s25_s12 = sadd.s32 1, %s932_s10  ;;  %p698_p0 = scmp.ge.s32.totalorder %s936_s11, 1  ;;  %s936_s11 = sphi %s959_s11, %s13_s11   ;;  %s932_s10 = sphi %s957_s10, %s1149_s10   ;;  %s928_s9 = sphi %s955_s9, %s1148_s9  }
   0x3   : > { %p27_p1 = scmp.ge.s32.totalorder %s25_s12, 2  ;;  %p140_p2 = scmp.lt.s32.totalorder %s936_s11, 3 }
   0x5   : > { %s1151_s12 = smov (%p27_p1, %s25_s12), 0  ;;  %p141_p3 = pnand %p698_p0, %p140_p2 }
   0x6   : > { %p169_p4 = scmp.lt.s32.totalorder (!%p141_p3), %s928_s9, 0  ;;  %s703_s13 = sshll.u32 (!%p141_p3), %s928_s9, 8  ;;  %v229_v0 = vlaneseq (!%p141_p3)  ;;  %v938_v2 = vmov (!%p141_p3), 1.0  }
   0x7   : > { %144 = sbr.rel (%p141_p3) target bundleno = 286 (0x11e), region = 24  ;;  %v977_v1 = vstv (!%p141_p3), %s703_s13  ;;  %488 = vmatprep.mubr.f32.mxu0 (!%p141_p3), %v938_v2  ;;  %594 = vmatprep.mubr.f32.mxu1 (!%p141_p3), %v938_v2  ;;  %p180_p6 = scmp.lt.s32.totalorder (!%p141_p3), %s928_s9, 1 }
   0x8   : > { %v982_v3 = vshrl.u32 (!%p141_p3), %v229_v0, 7 }
   0xa   : > { %v246_v4 = vadd.s32 (!%p141_p3), 128, %v982_v3  ;;  %v247_v5 = vadd.s32 (!%p141_p3), 136, %v982_v3  ;;  %v231_v6 = vadd.s32 (!%p141_p3), 8, %v982_v3  ;;  %v263_v7 = vadd.s32 (!%p141_p3), %v977_v1, %v982_v3 }
   0xb   : > { %v248_v8 = vadd.s32 (!%p141_p3), 144, %v982_v3  ;;  %v249_v9 = vadd.s32 (!%p141_p3), 152, %v982_v3  ;;  %v232_v10 = vadd.s32 (!%p141_p3), 16, %v982_v3  ;;  %v233_v11 = vadd.s32 (!%p141_p3), 24, %v982_v3 }
   0xc   : > { %v279_v12 = vadd.s32 (!%p141_p3), %v977_v1, %v246_v4  ;;  %v280_v13 = vadd.s32 (!%p141_p3), %v977_v1, %v247_v5  ;;  %v264_v14 = vadd.s32 (!%p141_p3), %v977_v1, %v231_v6  ;;  %vm295_vm2 = vcmp.lt.s32.totalorder (!%p141_p3), %v263_v7, 256 }
   0xd   : > { %v281_v15 = vadd.s32 (!%p141_p3), %v977_v1, %v248_v8  ;;  %v282_v16 = vadd.s32 (!%p141_p3), %v977_v1, %v249_v9  ;;  %v265_v17 = vadd.s32 (!%p141_p3), %v977_v1, %v232_v10  ;;  %v266_v18 = vadd.s32 (!%p141_p3), %v977_v1, %v233_v11 }
   0xe   : > { %s170_s14 = scalar_select %p169_p4, %s928_s9, 0  ;;  %vm311_vm0 = vcmp.lt.s32.totalorder %v279_v12, 256  ;;  %vm312_vm1 = vcmp.lt.s32.totalorder %v280_v13, 256  ;;  %v250_v19 = vadd.s32 160, %v982_v3  ;;  %vm296_vm4 = vcmp.lt.s32.totalorder %v264_v14, 256 }
   0xf   : > { %vm1003_vm3 = vmpackc.low %vm312_vm1, %vm311_vm0  ;;  %vm313_vm5 = vcmp.lt.s32.totalorder %v281_v15, 256  ;;  %vm314_vm6 = vcmp.lt.s32.totalorder %v282_v16, 256  ;;  %vm297_vm7 = vcmp.lt.s32.totalorder %v265_v17, 256  ;;  %vm298_vm9 = vcmp.lt.s32.totalorder %v266_v18, 256  ;;  %s1155_s9 = smov (!%p180_p6, %s928_s9), 1 }
  0x10   : > { %s699_s15 = sshll.u32 %s170_s14, 5  ;;  %vm1014_vm8 = vmpackc.low %vm296_vm4, %vm295_vm2  ;;  %v251_v22 = vadd.s32 168, %v982_v3  ;;  %v234_v23 = vadd.s32 32, %v982_v3  ;;  %v235_v24 = vadd.s32 40, %v982_v3  ;;  %v283_v28 = vadd.s32 %v977_v1, %v250_v19  ;;  %s701_s20 = sshll.u32 %s1155_s9, 3 }
  0x11   : > { %p172_p5 = scmp.lt.s32.totalorder %s699_s15, 31  ;;  %v252_v29 = vadd.s32 176, %v982_v3  ;;  %v253_v30 = vadd.s32 184, %v982_v3  ;;  %v1028_v31 = vadd.s32 48, %v982_v3  ;;  %vm815_vm10 = vmpackc.low %vm314_vm6, %vm313_vm5  ;;  %v237_v10 = vadd.s32 56, %v982_v3  ;;  %s183_s23 = scalar_lea.vmem %s1142_s1, %s701_s20 }
  0x12   : > { %vm818_vm11 = vmpackc.low %vm298_vm9, %vm297_vm7  ;;  %vm315_vm12 = vcmp.lt.s32.totalorder %v283_v28, 256  ;;  %v284_v62 = vadd.s32 %v977_v1, %v251_v22  ;;  %v267_v5 = vadd.s32 %v977_v1, %v234_v23  ;;  %v268_v9 = vadd.s32 %v977_v1, %v235_v24  ;;  %s187_s26 = scalar_lea.vmem %s1143_s2, %s701_s20 }
  0x13   : > { %s1153_s15 = smov (!%p172_p5, %s699_s15), 31  ;;  %v285_v13 = vadd.s32 %v977_v1, %v252_v29  ;;  %v286_v17 = vadd.s32 %v977_v1, %v253_v30  ;;  %v269_v29 = vadd.s32 %v977_v1, %v1028_v31 }
  0x14   : > { %s700_s16 = sshll.u32 %s1153_s15, 3  ;;  %vm316_vm13 = vcmp.lt.s32.totalorder %v284_v62, 256  ;;  %vm299_vm14 = vcmp.lt.s32.totalorder %v267_v5, 256 }
  0x15   : > { %s1010_s19 = scalar_lea.vmem %s1141_s0, %s700_s16  ;;  %vm821_vm15 = vmpackc.low %vm316_vm13, %vm315_vm12 }
  0x16   : > { %v211_v25 = vld [vmem:[%s1010_s19 + $0x80] sm:$0xff]  ;;  %v212_v26 = vld [vmem:[%s1010_s19 + $0x88] sm:$0xff]  ;;  %v213_v37 = vld [vmem:[%s1010_s19 + $0x90] sm:$0xff] }
  0x17   : > { %v195_v27 = vld [vmem:[%s1010_s19] sm:$0xff]  ;;  %v808_v32 = vpack.c.bf16 %v212_v26, %v211_v25  ;;  %v196_v33 = vld [vmem:[%s1010_s19 + $0x8] sm:$0xff]  ;;  %v407_v34 = vsel %vm311_vm0, %v211_v25, 0.0  ;;  %v408_v35 = vsel %vm312_vm1, %v212_v26, 0.0  ;;  %v214_v38 = vld [vmem:[%s1010_s19 + $0x98] sm:$0xff]  ;;  %v409_v47 = vsel %vm313_vm5, %v213_v37, 0.0 }
  0x18   : > { %v391_v36 = vsel %vm295_vm2, %v195_v27, 0.0  ;;  %v811_v39 = vpack.c.bf16 %v196_v33, %v195_v27  ;;  %v514_v40 = vmul.f32 %v407_v34, %v407_v34  ;;  %v515_v41 = vmul.f32 %v408_v35, %v408_v35  ;;  %v197_v43 = vld [vmem:[%s1010_s19 + $0x10] sm:$0xff]  ;;  %v198_v44 = vld [vmem:[%s1010_s19 + $0x18] sm:$0xff]  ;;  %v215_v53 = vld [vmem:[%s1010_s19 + $0xa0] sm:$0xff] }
  0x19   : > { %v392_v42 = vsel %vm296_vm4, %v196_v33, 0.0  ;;  %810 = vmatprep.subr.msk.bf16.mxu0 %vm1003_vm3, %v808_v32  ;;  %v498_v45 = vmul.f32 %v391_v36, %v391_v36  ;;  %v410_v48 = vsel %vm314_vm6, %v214_v38, 0.0  ;;  %v814_v50 = vpack.c.bf16 %v214_v38, %v213_v37  ;;  %v216_v61 = vld [vmem:[%s1010_s19 + $0xa8] sm:$0xff]  ;;  %v199_v4 = vld [vmem:[%s1010_s19 + $0x20] sm:$0xff]  ;;  %v217_v12 = vld [vmem:[%s1010_s19 + $0xb0] sm:$0xff] }
  0x1a   : > { %v499_v46 = vmul.f32 %v392_v42, %v392_v42  ;;  %813 = vmatpush3.bf16.msk.msra.mxu0 %vm1014_vm8, %v811_v39  ;;  %v856_v49 = vpack.c.bf16 %v515_v41, %v514_v40  ;;  %v516_v51 = vmul.f32 %v409_v47, %v409_v47  ;;  %v517_v52 = vmul.f32 %v410_v48, %v410_v48  ;;  %v200_v8 = vld [vmem:[%s1010_s19 + $0x28] sm:$0xff]  ;;  %v218_v16 = vld [vmem:[%s1010_s19 + $0xb8] sm:$0xff]  ;;  %v201_v27 = vld [vmem:[%s1010_s19 + $0x30] sm:$0xff] }
  0x1b   : > { %v393_v55 = vsel %vm297_vm7, %v197_v43, 0.0  ;;  %v394_v56 = vsel %vm298_vm9, %v198_v44, 0.0  ;;  %v817_v57 = vpack.c.bf16 %v198_v44, %v197_v43  ;;  %816 = vmatprep.subr.msk.bf16.mxu0 %vm815_vm10, %v814_v50  ;;  %v411_v63 = vsel %vm315_vm12, %v215_v53, 0.0  ;;  %v202_v28 = vld [vmem:[%s1010_s19 + $0x38] sm:$0xff]  ;;  %v219_v35 = vld [vmem:[%s1010_s19 + $0xc0] sm:$0xff]  ;;  %v220_v36 = vld [vmem:[%s1010_s19 + $0xc8] sm:$0xff] }
  0x1c   : > { %v858_v54 = vpack.c.bf16 %v499_v46, %v498_v45  ;;  %857 = vmatprep.subr.bf16.mxu1 %v856_v49  ;;  %v500_v58 = vmul.f32 %v393_v55, %v393_v55  ;;  %v501_v59 = vmul.f32 %v394_v56, %v394_v56  ;;  %v860_v60 = vpack.c.bf16 %v517_v52, %v516_v51  ;;  %v203_v46 = vld [vmem:[%s1010_s19 + $0x40] sm:$0xff]  ;;  %v204_v47 = vld [vmem:[%s1010_s19 + $0x48] sm:$0xff] }
  0x1d   : > { %v820_v0 = vpack.c.bf16 %v216_v61, %v215_v53  ;;  %v518_v7 = vmul.f32 %v411_v63, %v411_v63  ;;  %v823_v11 = vpack.c.bf16 %v200_v8, %v199_v4  ;;  %v412_v14 = vsel %vm316_vm13, %v216_v61, 0.0  ;;  %v222_v61 = vld [vmem:[%s1010_s19 + $0xd8] sm:$0xff] }
  0x1e   : > { %859 = vmatpush3.bf16.msra.mxu1 %v858_v54  ;;  %819 = vmatpush3.bf16.msk.msra.mxu0 %vm818_vm11, %v817_v57  ;;  %v862_v6 = vpack.c.bf16 %v501_v59, %v500_v58  ;;  %vm300_vm0 = vcmp.lt.s32.totalorder %v268_v9, 256  ;;  %v395_v15 = vsel %vm299_vm14, %v199_v4, 0.0  ;;  %v519_v18 = vmul.f32 %v412_v14, %v412_v14 }
  0x1f   : > { %861 = vmatprep.subr.bf16.mxu1 %v860_v60  ;;  %822 = vmatprep.subr.msk.bf16.mxu0 %vm821_vm15, %v820_v0  ;;  %v396_v19 = vsel %vm300_vm0, %v200_v8, 0.0  ;;  %vm824_vm1 = vmpackc.low %vm300_vm0, %vm299_vm14  ;;  %v502_v20 = vmul.f32 %v395_v15, %v395_v15  ;;  %vm317_vm2 = vcmp.lt.s32.totalorder %v285_v13, 256  ;;  %vm318_vm3 = vcmp.lt.s32.totalorder %v286_v17, 256  ;;  %v221_v60 = vld [vmem:[%s1010_s19 + $0xd0] sm:$0xff] }
  0x20   : > { %v503_v21 = vmul.f32 %v396_v19, %v396_v19  ;;  %v413_v22 = vsel %vm317_vm2, %v217_v12, 0.0  ;;  %v826_v23 = vpack.c.bf16 %v218_v16, %v217_v12  ;;  %v864_v24 = vpack.c.bf16 %v519_v18, %v518_v7  ;;  %vm827_vm4 = vmpackc.low %vm318_vm3, %vm317_vm2 }
  0x21   : > { %v414_v25 = vsel %vm318_vm3, %v218_v16, 0.0  ;;  %v520_v26 = vmul.f32 %v413_v22, %v413_v22  ;;  %v270_v33 = vadd.s32 %v977_v1, %v237_v10  ;;  %v829_v34 = vpack.c.bf16 %v202_v28, %v201_v27  ;;  %v205_v10 = vld [vmem:[%s1010_s19 + $0x50] sm:$0xff] }
  0x22   : > { %863 = vmatpush3.bf16.msra.mxu1 %v862_v6  ;;  %825 = vmatpush3.bf16.msk.msra.mxu0 %vm824_vm1, %v823_v11  ;;  %v866_v30 = vpack.c.bf16 %v503_v21, %v502_v20  ;;  %v521_v32 = vmul.f32 %v414_v25, %v414_v25  ;;  %vm301_vm5 = vcmp.lt.s32.totalorder %v269_v29, 256  ;;  %v254_v37 = vadd.s32 192, %v982_v3  ;;  %v206_v11 = vld [vmem:[%s1010_s19 + $0x58] sm:$0xff]  ;;  %v223_v20 = vld [vmem:[%s1010_s19 + $0xe0] sm:$0xff]  ;;  %v224_v21 = vld [vmem:[%s1010_s19 + $0xe8] sm:$0xff] }
  0x23   : > { %828 = vmatprep.subr.msk.bf16.mxu0 %vm827_vm4, %v826_v23  ;;  %865 = vmatprep.subr.bf16.mxu1 %v864_v24  ;;  %v255_v38 = vadd.s32 200, %v982_v3  ;;  %v832_v39 = vpack.c.bf16 %v220_v36, %v219_v35  ;;  %vm302_vm6 = vcmp.lt.s32.totalorder %v270_v33, 256  ;;  %v397_v31 = vsel %vm301_vm5, %v201_v27, 0.0  ;;  %v207_v33 = vld [vmem:[%s1010_s19 + $0x60] sm:$0xff] }
  0x24   : > { %v868_v40 = vpack.c.bf16 %v521_v32, %v520_v26  ;;  %v238_v41 = vadd.s32 64, %v982_v3  ;;  %v398_v42 = vsel %vm302_vm6, %v202_v28, 0.0  ;;  %vm830_vm7 = vmpackc.low %vm302_vm6, %vm301_vm5  ;;  %v504_v43 = vmul.f32 %v397_v31, %v397_v31 }
  0x25   : > { %v287_v44 = vadd.s32 %v977_v1, %v254_v37  ;;  %v288_v45 = vadd.s32 %v977_v1, %v255_v38  ;;  %v505_v48 = vmul.f32 %v398_v42, %v398_v42  ;;  %v239_v49 = vadd.s32 72, %v982_v3  ;;  %v208_v37 = vld [vmem:[%s1010_s19 + $0x68] sm:$0xff] }
  0x26   : > { %867 = vmatpush3.bf16.msra.mxu1 %v866_v30  ;;  %831 = vmatpush3.bf16.msk.msra.mxu0 %vm830_vm7, %v829_v34  ;;  %v271_v50 = vadd.s32 %v977_v1, %v238_v41  ;;  %v835_v51 = vpack.c.bf16 %v204_v47, %v203_v46  ;;  %v256_v52 = vadd.s32 208, %v982_v3  ;;  %v257_v53 = vadd.s32 216, %v982_v3 }
  0x27   : > { %869 = vmatprep.subr.bf16.mxu1 %v868_v40  ;;  %vm319_vm8 = vcmp.lt.s32.totalorder %v287_v44, 256  ;;  %vm320_vm9 = vcmp.lt.s32.totalorder %v288_v45, 256  ;;  %v870_v54 = vpack.c.bf16 %v505_v48, %v504_v43  ;;  %v272_v57 = vadd.s32 %v977_v1, %v239_v49 }
  0x28   : > { %v415_v55 = vsel %vm319_vm8, %v219_v35, 0.0  ;;  %v416_v56 = vsel %vm320_vm9, %v220_v36, 0.0  ;;  %vm833_vm10 = vmpackc.low %vm320_vm9, %vm319_vm8  ;;  %vm303_vm11 = vcmp.lt.s32.totalorder %v271_v50, 256  ;;  %v289_v62 = vadd.s32 %v977_v1, %v256_v52  ;;  %v225_v52 = vld [vmem:[%s1010_s19 + $0xf0] sm:$0xff] }
  0x29   : > { %834 = vmatprep.subr.msk.bf16.mxu0 %vm833_vm10, %v832_v39  ;;  %v522_v58 = vmul.f32 %v415_v55, %v415_v55  ;;  %v523_v59 = vmul.f32 %v416_v56, %v416_v56  ;;  %vm304_vm12 = vcmp.lt.s32.totalorder %v272_v57, 256  ;;  %v399_v63 = vsel %vm303_vm11, %v203_v46, 0.0 }
  0x2a   : > { %871 = vmatpush3.bf16.msra.mxu1 %v870_v54  ;;  %v290_v0 = vadd.s32 %v977_v1, %v257_v53  ;;  %v838_v4 = vpack.c.bf16 %v222_v61, %v221_v60  ;;  %v400_v5 = vsel %vm304_vm12, %v204_v47, 0.0  ;;  %vm836_vm13 = vmpackc.low %vm304_vm12, %vm303_vm11  ;;  %v506_v6 = vmul.f32 %v399_v63, %v399_v63  ;;  %v226_v53 = vld [vmem:[%s1010_s19 + $0xf8] sm:$0xff] }
  0x2b   : > { %v872_v7 = vpack.c.bf16 %v523_v59, %v522_v58  ;;  %vm321_vm14 = vcmp.lt.s32.totalorder %v289_v62, 256  ;;  %837 = vmatpush3.bf16.msk.msra.mxu0 %vm836_vm13, %v835_v51  ;;  %v507_v8 = vmul.f32 %v400_v5, %v400_v5  ;;  %v240_v12 = vadd.s32 80, %v982_v3 }
  0x2c   : > { %vm322_vm15 = vcmp.lt.s32.totalorder %v290_v0, 256  ;;  %v417_v9 = vsel %vm321_vm14, %v221_v60, 0.0  ;;  %v241_v15 = vadd.s32 88, %v982_v3  ;;  %v841_v16 = vpack.c.bf16 %v206_v11, %v205_v10  ;;  %v209_v60 = vld [vmem:[%s1010_s19 + $0x70] sm:$0xff] }
  0x2d   : > { %873 = vmatprep.subr.bf16.mxu1 %v872_v7  ;;  %v418_v13 = vsel %vm322_vm15, %v222_v61, 0.0  ;;  %vm839_vm0 = vmpackc.low %vm322_vm15, %vm321_vm14  ;;  %v524_v14 = vmul.f32 %v417_v9, %v417_v9  ;;  %v874_v17 = vpack.c.bf16 %v507_v8, %v506_v6  ;;  %v273_v19 = vadd.s32 %v977_v1, %v240_v12  ;;  %v210_v61 = vld [vmem:[%s1010_s19 + $0x78] sm:$0xff] }
  0x2e   : > { %840 = vmatprep.subr.msk.bf16.mxu0 %vm839_vm0, %v838_v4  ;;  %v525_v18 = vmul.f32 %v418_v13, %v418_v13  ;;  %v258_v22 = vadd.s32 224, %v982_v3  ;;  %v274_v23 = vadd.s32 %v977_v1, %v241_v15  ;;  %v259_v24 = vadd.s32 232, %v982_v3 }
  0x2f   : > { %v844_v25 = vpack.c.bf16 %v224_v21, %v223_v20  ;;  %v242_v26 = vadd.s32 96, %v982_v3  ;;  %875 = vmatpush3.bf16.msra.mxu1 %v874_v17  ;;  %vm305_vm1 = vcmp.lt.s32.totalorder %v273_v19, 256  ;;  %v243_v29 = vadd.s32 104, %v982_v3 }
  0x30   : > { %v876_v27 = vpack.c.bf16 %v525_v18, %v524_v14  ;;  %v291_v28 = vadd.s32 %v977_v1, %v258_v22  ;;  %vm306_vm2 = vcmp.lt.s32.totalorder %v274_v23, 256  ;;  %v401_v30 = vsel %vm305_vm1, %v205_v10, 0.0 }
  0x31   : > { %v292_v32 = vadd.s32 %v977_v1, %v259_v24  ;;  %v275_v34 = vadd.s32 %v977_v1, %v242_v26  ;;  %v402_v35 = vsel %vm306_vm2, %v206_v11, 0.0  ;;  %vm842_vm3 = vmpackc.low %vm306_vm2, %vm305_vm1  ;;  %v508_v36 = vmul.f32 %v401_v30, %v401_v30 }
  0x32   : > { %877 = vmatprep.subr.bf16.mxu1 %v876_v27  ;;  %vm323_vm4 = vcmp.lt.s32.totalorder %v291_v28, 256  ;;  %v276_v38 = vadd.s32 %v977_v1, %v243_v29  ;;  %843 = vmatpush3.bf16.msk.msra.mxu0 %vm842_vm3, %v841_v16  ;;  %v509_v39 = vmul.f32 %v402_v35, %v402_v35  ;;  %v847_v46 = vpack.c.bf16 %v208_v37, %v207_v33 }
  0x33   : > { %vm324_vm5 = vcmp.lt.s32.totalorder %v292_v32, 256  ;;  %v419_v31 = vsel %vm323_vm4, %v223_v20, 0.0  ;;  %vm307_vm6 = vcmp.lt.s32.totalorder %v275_v34, 256  ;;  %v260_v49 = vadd.s32 240, %v982_v3 }
  0x34   : > { %v420_v40 = vsel %vm324_vm5, %v224_v21, 0.0  ;;  %vm845_vm7 = vmpackc.low %vm324_vm5, %vm323_vm4  ;;  %v526_v41 = vmul.f32 %v419_v31, %v419_v31  ;;  %vm308_vm8 = vcmp.lt.s32.totalorder %v276_v38, 256  ;;  %v403_v42 = vsel %vm307_vm6, %v207_v33, 0.0 }
  0x35   : > { %v878_v43 = vpack.c.bf16 %v509_v39, %v508_v36  ;;  %846 = vmatprep.subr.msk.bf16.mxu0 %vm845_vm7, %v844_v25  ;;  %v527_v44 = vmul.f32 %v420_v40, %v420_v40  ;;  %v404_v45 = vsel %vm308_vm8, %v208_v37, 0.0  ;;  %vm848_vm9 = vmpackc.low %vm308_vm8, %vm307_vm6  ;;  %v510_v47 = vmul.f32 %v403_v42, %v403_v42 }
  0x36   : > { %v511_v48 = vmul.f32 %v404_v45, %v404_v45  ;;  %v261_v50 = vadd.s32 248, %v982_v3  ;;  %849 = vmatpush3.bf16.msk.msra.mxu0 %vm848_vm9, %v847_v46  ;;  %v244_v54 = vadd.s32 112, %v982_v3  ;;  %v245_v55 = vadd.s32 120, %v982_v3 }
  0x37   : > { %879 = vmatpush3.bf16.msra.mxu1 %v878_v43  ;;  %v880_v51 = vpack.c.bf16 %v527_v44, %v526_v41  ;;  %v293_v57 = vadd.s32 %v977_v1, %v260_v49  ;;  %v850_v59 = vpack.c.bf16 %v226_v53, %v225_v52  ;;  %v853_v0 = vpack.c.bf16 %v210_v61, %v209_v60 }
  0x38   : > { %v882_v56 = vpack.c.bf16 %v511_v48, %v510_v47  ;;  %v294_v58 = vadd.s32 %v977_v1, %v261_v50  ;;  %v277_v62 = vadd.s32 %v977_v1, %v244_v54  ;;  %v278_v63 = vadd.s32 %v977_v1, %v245_v55 }
  0x39   : > { %881 = vmatprep.subr.bf16.mxu1 %v880_v51  ;;  %vm325_vm10 = vcmp.lt.s32.totalorder %v293_v57, 256  ;;  %vm192_vm0 = vcmask 261120   ;;  %v939_v12 = vmov 0.0  }
  0x3a   : > { %vm326_vm11 = vcmp.lt.s32.totalorder %v294_v58, 256  ;;  %v421_v4 = vsel %vm325_vm10, %v225_v52, 0.0  ;;  %vm309_vm13 = vcmp.lt.s32.totalorder %v277_v62, 256  ;;  %vm310_vm14 = vcmp.lt.s32.totalorder %v278_v63, 256  ;;  %193 = vst.msk [vmem:[%s183_s23] sm:$0xff] %vm192_vm0, %v939_v12  ;;  %194 = vst.msk [vmem:[%s187_s26] sm:$0xff] %vm192_vm0, %v939_v12 }
  0x3b   : > { %883 = vmatpush3.bf16.msra.mxu1 %v882_v56  ;;  %v422_v5 = vsel %vm326_vm11, %v226_v53, 0.0  ;;  %vm851_vm12 = vmpackc.low %vm326_vm11, %vm325_vm10  ;;  %v528_v3 = vmul.f32 %v421_v4, %v421_v4  ;;  %v405_v7 = vsel %vm309_vm13, %v209_v60, 0.0  ;;  %v406_v8 = vsel %vm310_vm14, %v210_v61, 0.0 }
  0x3c   : > { %852 = vmatprep.subr.msk.bf16.mxu0 %vm851_vm12, %v850_v59  ;;  %v529_v6 = vmul.f32 %v422_v5, %v422_v5  ;;  %vm854_vm15 = vmpackc.low %vm310_vm14, %vm309_vm13  ;;  %v512_v9 = vmul.f32 %v405_v7, %v405_v7  ;;  %v513_v1 = vmul.f32 %v406_v8, %v406_v8 }
  0x3d   : > { %855 = vmatpush3.bf16.msk.msra.mxu0 %vm854_vm15, %v853_v0 }
  0x3e   : > { %v884_v10 = vpack.c.bf16 %v529_v6, %v528_v3  ;;  %v886_v11 = vpack.c.bf16 %v513_v1, %v512_v9 }
  0x40   : > { %885 = vmatprep.subr.bf16.mxu1 %v884_v10  ;;  %489 = vmatmul.mubr.f32.vlgmr.msra.gmra.mrb[0].mxu0 %v938_v2 }
  0x41   : > { %887 = vmatpush3.bf16.msra.mxu1 %v886_v11  ;;  %v423_v14 = vld [vmem:[%s183_s23] sm:$0xff] }
  0x42   : > { %v497_v18 = vld [vmem:[%s187_s26] sm:$0xff] }
  0x44   : > { %595 = vmatmul.mubr.f32.vlgmr.msra.gmra.mrb[0].mxu1 %v938_v2 }
 0x113   : > { %v770_v13 = vpop.f32.mrb[0].mxu0 }
 0x114   : > { %v771_v2 = vpop.f32.mrb[1].mxu0 }
 0x115   : > { %v772_v15 = vadd.f32 %v771_v2, %v770_v13 }
 0x117   : > { %v494_v16 = vadd.f32 %v772_v15, %v423_v14  ;;  %v805_v17 = vpop.f32.mrb[0].mxu1 }
 0x118   : > { %v806_v19 = vpop.f32.mrb[1].mxu1 }
 0x119   : > { %496 = vst.msk [vmem:[%s183_s23] sm:$0xff] %vm192_vm0, %v494_v16  ;;  %v807_v20 = vadd.f32 %v806_v19, %v805_v17 }
 0x11b   : > { %v600_v21 = vadd.f32 %v807_v20, %v497_v18 }
 0x11d   : > { %601 = vst.msk [vmem:[%s187_s26] sm:$0xff] %vm192_vm0, %v600_v21 }
 0x11e PF: > { %s13_s11 = sadd.s32 1, %s936_s11   ;;  %s1148_s9 = smov %s932_s10 }
 0x11f   : > { %p10_p7 = scmp.ge.s32.totalorder %s13_s11, 4   ;;  %s1149_s10 = smov %s1151_s12 }
 0x121   :  { %12 = sbr.rel (!%p10_p7) target bundleno = 2 (0x2), region = 70 }

// kernel: residual_mlp_downsample.3
= control target key start
LH: loop header
LB: loop body
LE: loop exit
PB: predicated region body
PF: predicated region fallthrough
CT: control target
= control target key end

     0   :  { %vm25_vm0 = vcmask 130048   ;;  %v1083_v1 = vmov 0.0   ;;  %vm232_vm1 = vcmask 261120   ;;  %s1672_s3 = inlined_call_operand.vmem [shape: bf16[32,16], index: 3, kind: input, shape index: {}]   ;;  %s1673_s0 = inlined_call_operand.vmem [shape: f32[256,32], index: 0, kind: input, shape index: {}]   ;;  %s1674_s1 = inlined_call_operand.vmem [shape: f32[1,32], index: 1, kind: input, shape index: {}]   ;;  %s1675_s2 = inlined_call_operand.vmem [shape: f32[1,32], index: 2, kind: input, shape index: {}]   ;;  %s1676_s4 = inlined_call_operand.vmem [shape: f32[1,16], index: 4, kind: input, shape index: {}]   ;;  %s1677_s5 = inlined_call_operand.vmem [shape: f32[256,16], index: 5, kind: output, shape index: {}]  }
   0x1   :  { %v953_v0 = vld [vmem:[%s1672_s3] sm:$0xff]   ;;  %28 = vst.msk [vmem:[#allocation2 + $0x10] sm:$0xff] %vm25_vm0, %v1083_v1  ;;  %26 = vst.msk [vmem:[#allocation2] sm:$0xff] %vm25_vm0, %v1083_v1  ;;  %v954_v2 = vld [vmem:[%s1672_s3 + $0x8] sm:$0xff]  }
   0x2   :  { %27 = vst.msk [vmem:[#allocation2 + $0x8] sm:$0xff] %vm25_vm0, %v1083_v1  ;;  %29 = vst.msk [vmem:[#allocation2 + $0x18] sm:$0xff] %vm25_vm0, %v1083_v1  ;;  %912 = vmatprep.subr.bf16.mxu0 %v953_v0  ;;  %948 = vmatprep.subr.bf16.mxu1 %v953_v0  ;;  %v58_v3 = vld [vmem:[%s1673_s0] sm:$0xff]  ;;  %v59_v4 = vld [vmem:[%s1673_s0 + $0x8] sm:$0xff] }
   0x3   :  { %30 = vst.msk [vmem:[#allocation2 + $0x20] sm:$0xff] %vm25_vm0, %v1083_v1  ;;  %31 = vst.msk [vmem:[#allocation2 + $0x28] sm:$0xff] %vm25_vm0, %v1083_v1  ;;  %v1161_v5 = vld [vmem:[%s1674_s1] ss:$0 sm:$0xff]  ;;  %913 = vmatpush3.bf16.msra.mxu0 %v953_v0  ;;  %950 = vmatpush3.bf16.msra.mxu1 %v953_v0  ;;  %v75_v10 = vld [vmem:[%s1673_s0 + $0x88] sm:$0xff] }
   0x4   :  { %32 = vst.msk [vmem:[#allocation2 + $0x30] sm:$0xff] %vm25_vm0, %v1083_v1  ;;  %33 = vst.msk [vmem:[#allocation2 + $0x38] sm:$0xff] %vm25_vm0, %v1083_v1  ;;  %v97_v6 = vmul.f32 %v1161_v5, %v58_v3  ;;  %v98_v7 = vmul.f32 %v1161_v5, %v59_v4  ;;  %v1168_v8 = vld [vmem:[%s1675_s2] ss:$0 sm:$0xff]  ;;  %914 = vmatprep.subr.bf16.mxu0 %v954_v2  ;;  %949 = vmatprep.subr.bf16.mxu1 %v954_v2  ;;  %v60_v13 = vld [vmem:[%s1673_s0 + $0x10] sm:$0xff] }
   0x5   :  { %34 = vst.msk [vmem:[#allocation2 + $0x40] sm:$0xff] %vm25_vm0, %v1083_v1  ;;  %35 = vst.msk [vmem:[#allocation2 + $0x48] sm:$0xff] %vm25_vm0, %v1083_v1  ;;  %v74_v9 = vld [vmem:[%s1673_s0 + $0x80] sm:$0xff]  ;;  %v114_v12 = vmul.f32 %v1161_v5, %v75_v10  ;;  %v61_v14 = vld [vmem:[%s1673_s0 + $0x18] sm:$0xff]  ;;  %v99_v18 = vmul.f32 %v1161_v5, %v60_v13 }
   0x6   :  { %36 = vst.msk [vmem:[#allocation2 + $0x50] sm:$0xff] %vm25_vm0, %v1083_v1  ;;  %37 = vst.msk [vmem:[#allocation2 + $0x58] sm:$0xff] %vm25_vm0, %v1083_v1  ;;  %v113_v11 = vmul.f32 %v1161_v5, %v74_v9  ;;  %v76_v15 = vld [vmem:[%s1673_s0 + $0x90] sm:$0xff]  ;;  %v136_v16 = vadd.f32 %v1168_v8, %v97_v6  ;;  %v137_v17 = vadd.f32 %v1168_v8, %v98_v7  ;;  %v77_v20 = vld [vmem:[%s1673_s0 + $0x98] sm:$0xff] }
   0x7   :  { %38 = vst.msk [vmem:[#allocation2 + $0x60] sm:$0xff] %vm25_vm0, %v1083_v1  ;;  %39 = vst.msk [vmem:[#allocation2 + $0x68] sm:$0xff] %vm25_vm0, %v1083_v1  ;;  %v100_v19 = vmul.f32 %v1161_v5, %v61_v14  ;;  %v62_v21 = vld [vmem:[%s1673_s0 + $0x20] sm:$0xff]  ;;  %v153_v23 = vadd.f32 %v1168_v8, %v114_v12  ;;  %v115_v24 = vmul.f32 %v1161_v5, %v76_v15  ;;  %v63_v26 = vld [vmem:[%s1673_s0 + $0x28] sm:$0xff]  ;;  %915 = vmatpush3.bf16.msra.mxu0 %v954_v2 }
   0x8   :  { %40 = vst.msk [vmem:[#allocation2 + $0x70] sm:$0xff] %vm25_vm0, %v1083_v1  ;;  %41 = vst.msk [vmem:[#allocation2 + $0x78] sm:$0xff] %vm25_vm0, %v1083_v1  ;;  %v152_v22 = vadd.f32 %v1168_v8, %v113_v11  ;;  %v116_v25 = vmul.f32 %v1161_v5, %v77_v20  ;;  %v78_v27 = vld [vmem:[%s1673_s0 + $0xa0] sm:$0xff]  ;;  %v79_v28 = vld [vmem:[%s1673_s0 + $0xa8] sm:$0xff]  ;;  %951 = vmatpush3.bf16.msra.mxu1 %v954_v2  ;;  %v204_v29 = vpack.c.bf16 %v137_v17, %v136_v16 }
   0x9   :  { %42 = vst.msk [vmem:[#allocation2 + $0x80] sm:$0xff] %vm25_vm0, %v1083_v1  ;;  %43 = vst.msk [vmem:[#allocation2 + $0x88] sm:$0xff] %vm25_vm0, %v1083_v1  ;;  %v138_v30 = vadd.f32 %v1168_v8, %v99_v18  ;;  %v139_v31 = vadd.f32 %v1168_v8, %v100_v19  ;;  %v64_v32 = vld [vmem:[%s1673_s0 + $0x30] sm:$0xff]  ;;  %v65_v33 = vld [vmem:[%s1673_s0 + $0x38] sm:$0xff]  ;;  %v154_v35 = vadd.f32 %v1168_v8, %v115_v24 }
   0xa   :  { %44 = vst.msk [vmem:[#allocation2 + $0x90] sm:$0xff] %vm25_vm0, %v1083_v1  ;;  %45 = vst.msk [vmem:[#allocation2 + $0x98] sm:$0xff] %vm25_vm0, %v1083_v1  ;;  %v212_v34 = vpack.c.bf16 %v153_v23, %v152_v22  ;;  %v155_v36 = vadd.f32 %v1168_v8, %v116_v25  ;;  %v101_v37 = vmul.f32 %v1161_v5, %v62_v21  ;;  %v80_v38 = vld [vmem:[%s1673_s0 + $0xb0] sm:$0xff]  ;;  %916 = vmatprep.mubr.msk.bf16.mxu0 %vm232_vm1, %v204_v29  ;;  %v81_v43 = vld [vmem:[%s1673_s0 + $0xb8] sm:$0xff] }
   0xb   :  { %46 = vst.msk [vmem:[#allocation2 + $0xa0] sm:$0xff] %vm25_vm0, %v1083_v1  ;;  %47 = vst.msk [vmem:[#allocation2 + $0xa8] sm:$0xff] %vm25_vm0, %v1083_v1  ;;  %v205_v39 = vpack.c.bf16 %v139_v31, %v138_v30  ;;  %v102_v40 = vmul.f32 %v1161_v5, %v63_v26  ;;  %v117_v41 = vmul.f32 %v1161_v5, %v78_v27  ;;  %v66_v44 = vld [vmem:[%s1673_s0 + $0x40] sm:$0xff]  ;;  %v67_v49 = vld [vmem:[%s1673_s0 + $0x48] sm:$0xff] }
   0xc   :  { %48 = vst.msk [vmem:[#allocation2 + $0xb0] sm:$0xff] %vm25_vm0, %v1083_v1  ;;  %49 = vst.msk [vmem:[#allocation2 + $0xb8] sm:$0xff] %vm25_vm0, %v1083_v1  ;;  %v118_v42 = vmul.f32 %v1161_v5, %v79_v28  ;;  %932 = vmatprep.mubr.msk.bf16.mxu1 %vm232_vm1, %v212_v34  ;;  %v213_v45 = vpack.c.bf16 %v155_v36, %v154_v35  ;;  %v140_v46 = vadd.f32 %v1168_v8, %v101_v37  ;;  %v82_v54 = vld [vmem:[%s1673_s0 + $0xc0] sm:$0xff]  ;;  %v83_v59 = vld [vmem:[%s1673_s0 + $0xc8] sm:$0xff] }
   0xd   :  { %50 = vst.msk [vmem:[#allocation2 + $0xc0] sm:$0xff] %vm25_vm0, %v1083_v1  ;;  %51 = vst.msk [vmem:[#allocation2 + $0xc8] sm:$0xff] %vm25_vm0, %v1083_v1  ;;  %v103_v47 = vmul.f32 %v1161_v5, %v64_v32  ;;  %v104_v48 = vmul.f32 %v1161_v5, %v65_v33  ;;  %917 = vmatmul.mubr.msk.bf16.vlgmr.msra.gmra.mrb[0].mxu0 %vm232_vm1, %v205_v39  ;;  %v141_v50 = vadd.f32 %v1168_v8, %v102_v40  ;;  %v68_v60 = vld [vmem:[%s1673_s0 + $0x50] sm:$0xff]  ;;  %v85_v9 = vld [vmem:[%s1673_s0 + $0xd8] sm:$0xff] }
   0xe   :  { %52 = vst.msk [vmem:[#allocation2 + $0xd0] sm:$0xff] %vm25_vm0, %v1083_v1  ;;  %53 = vst.msk [vmem:[#allocation2 + $0xd8] sm:$0xff] %vm25_vm0, %v1083_v1  ;;  %v156_v51 = vadd.f32 %v1168_v8, %v117_v41  ;;  %v157_v52 = vadd.f32 %v1168_v8, %v118_v42  ;;  %v119_v53 = vmul.f32 %v1161_v5, %v80_v38  ;;  %933 = vmatmul.mubr.msk.bf16.vlgmr.msra.gmra.mrb[0].mxu1 %vm232_vm1, %v213_v45  ;;  %v84_v2 = vld [vmem:[%s1673_s0 + $0xd0] sm:$0xff]  ;;  %v70_v13 = vld [vmem:[%s1673_s0 + $0x60] sm:$0xff] }
   0xf   :  { %54 = vst.msk [vmem:[#allocation2 + $0xe0] sm:$0xff] %vm25_vm0, %v1083_v1  ;;  %55 = vst.msk [vmem:[#allocation2 + $0xe8] sm:$0xff] %vm25_vm0, %v1083_v1  ;;  %v142_v55 = vadd.f32 %v1168_v8, %v103_v47  ;;  %v143_v56 = vadd.f32 %v1168_v8, %v104_v48  ;;  %v120_v57 = vmul.f32 %v1161_v5, %v81_v43  ;;  %v71_v14 = vld [vmem:[%s1673_s0 + $0x68] sm:$0xff]  ;;  %v86_v19 = vld [vmem:[%s1673_s0 + $0xe0] sm:$0xff] }
  0x10   :  { %56 = vst.msk [vmem:[#allocation2 + $0xf0] sm:$0xff] %vm25_vm0, %v1083_v1  ;;  %57 = vst.msk [vmem:[#allocation2 + $0xf8] sm:$0xff] %vm25_vm0, %v1083_v1  ;;  %v105_v58 = vmul.f32 %v1161_v5, %v66_v44  ;;  %v206_v61 = vpack.c.bf16 %v141_v50, %v140_v46  ;;  %v214_v62 = vpack.c.bf16 %v157_v52, %v156_v51  ;;  %v69_v1 = vld [vmem:[%s1673_s0 + $0x58] sm:$0xff]  ;;  %v87_v20 = vld [vmem:[%s1673_s0 + $0xe8] sm:$0xff] }
  0x11   :  { %v158_v63 = vadd.f32 %v1168_v8, %v119_v53  ;;  %v106_v0 = vmul.f32 %v1161_v5, %v67_v49  ;;  %v207_v3 = vpack.c.bf16 %v143_v56, %v142_v55  ;;  %v159_v4 = vadd.f32 %v1168_v8, %v120_v57  ;;  %v72_v35 = vld [vmem:[%s1673_s0 + $0x70] sm:$0xff]  ;;  %v73_v36 = vld [vmem:[%s1673_s0 + $0x78] sm:$0xff]  ;;  %v172_v56 = vld [vmem:[#allocation2] sm:$0xff] }
  0x12   :  { %v144_v6 = vadd.f32 %v1168_v8, %v105_v58  ;;  %v121_v7 = vmul.f32 %v1161_v5, %v82_v54  ;;  %920 = vmatprep.mubr.msk.bf16.mxu0 %vm232_vm1, %v206_v61  ;;  %936 = vmatprep.mubr.msk.bf16.mxu1 %vm232_vm1, %v214_v62  ;;  %v122_v11 = vmul.f32 %v1161_v5, %v83_v59  ;;  %v88_v39 = vld [vmem:[%s1673_s0 + $0xf0] sm:$0xff]  ;;  %v89_v40 = vld [vmem:[%s1673_s0 + $0xf8] sm:$0xff]  ;;  %v188_v58 = vld [vmem:[#allocation2 + $0x80] sm:$0xff] }
  0x13   :  { %v145_v10 = vadd.f32 %v1168_v8, %v106_v0  ;;  %v107_v12 = vmul.f32 %v1161_v5, %v68_v60  ;;  %v215_v15 = vpack.c.bf16 %v159_v4, %v158_v63  ;;  %v108_v17 = vmul.f32 %v1161_v5, %v69_v1  ;;  %v190_v55 = vld [vmem:[#allocation2 + $0x90] sm:$0xff]  ;;  %v175_v59 = vld [vmem:[#allocation2 + $0x18] sm:$0xff]  ;;  %v173_v0 = vld [vmem:[#allocation2 + $0x8] sm:$0xff] }
  0x14   :  { %v160_v16 = vadd.f32 %v1168_v8, %v121_v7  ;;  %v123_v18 = vmul.f32 %v1161_v5, %v84_v2  ;;  %v161_v22 = vadd.f32 %v1168_v8, %v122_v11  ;;  %v124_v23 = vmul.f32 %v1161_v5, %v85_v9  ;;  %v191_v63 = vld [vmem:[#allocation2 + $0x98] sm:$0xff]  ;;  %v189_v4 = vld [vmem:[#allocation2 + $0x88] sm:$0xff] }
  0x15   :  { %v208_v21 = vpack.c.bf16 %v145_v10, %v144_v6  ;;  %v146_v24 = vadd.f32 %v1168_v8, %v107_v12  ;;  %v147_v25 = vadd.f32 %v1168_v8, %v108_v17  ;;  %v109_v26 = vmul.f32 %v1161_v5, %v70_v13  ;;  %921 = vmatmul.mubr.msk.bf16.gmra.mrb[4].mxu0 %vm232_vm1, %v207_v3  ;;  %v176_v17 = vld [vmem:[#allocation2 + $0x20] sm:$0xff] }
  0x16   :  { %v110_v27 = vmul.f32 %v1161_v5, %v71_v14  ;;  %v216_v28 = vpack.c.bf16 %v161_v22, %v160_v16  ;;  %v162_v29 = vadd.f32 %v1168_v8, %v123_v18  ;;  %v125_v30 = vmul.f32 %v1161_v5, %v86_v19  ;;  %937 = vmatmul.mubr.msk.bf16.gmra.mrb[4].mxu1 %vm232_vm1, %v215_v15  ;;  %v178_v15 = vld [vmem:[#allocation2 + $0x30] sm:$0xff]  ;;  %v1349_v18 = vld [vmem:[%s1676_s4] ss:$0 sm:$0xff] }
  0x17   :  { %v126_v31 = vmul.f32 %v1161_v5, %v87_v20  ;;  %924 = vmatprep.mubr.msk.bf16.mxu0 %vm232_vm1, %v208_v21  ;;  %v163_v32 = vadd.f32 %v1168_v8, %v124_v23  ;;  %v148_v33 = vadd.f32 %v1168_v8, %v109_v26  ;;  %v209_v41 = vpack.c.bf16 %v147_v25, %v146_v24  ;;  %v194_v16 = vld [vmem:[#allocation2 + $0xb0] sm:$0xff]  ;;  %v192_v20 = vld [vmem:[#allocation2 + $0xa0] sm:$0xff]  ;;  %v179_v21 = vld [vmem:[#allocation2 + $0x38] sm:$0xff] }
  0x18   :  { %v149_v34 = vadd.f32 %v1168_v8, %v110_v27  ;;  %940 = vmatprep.mubr.msk.bf16.mxu1 %vm232_vm1, %v216_v28  ;;  %v164_v37 = vadd.f32 %v1168_v8, %v125_v30  ;;  %v111_v42 = vmul.f32 %v1161_v5, %v72_v35  ;;  %v112_v43 = vmul.f32 %v1161_v5, %v73_v36  ;;  %v195_v25 = vld [vmem:[#allocation2 + $0xb8] sm:$0xff]  ;;  %v177_v26 = vld [vmem:[#allocation2 + $0x28] sm:$0xff] }
  0x19   :  { %v165_v38 = vadd.f32 %v1168_v8, %v126_v31  ;;  %v217_v44 = vpack.c.bf16 %v163_v32, %v162_v29  ;;  %v127_v46 = vmul.f32 %v1161_v5, %v88_v39  ;;  %v128_v47 = vmul.f32 %v1161_v5, %v89_v40  ;;  %v174_v5 = vld [vmem:[#allocation2 + $0x10] sm:$0xff]  ;;  %v193_v32 = vld [vmem:[#allocation2 + $0xa8] sm:$0xff] }
  0x1a   :  { %v210_v45 = vpack.c.bf16 %v149_v34, %v148_v33  ;;  %v150_v49 = vadd.f32 %v1168_v8, %v111_v42  ;;  %v151_v50 = vadd.f32 %v1168_v8, %v112_v43 }
  0x1b   :  { %v218_v48 = vpack.c.bf16 %v165_v38, %v164_v37  ;;  %v166_v51 = vadd.f32 %v1168_v8, %v127_v46  ;;  %v167_v52 = vadd.f32 %v1168_v8, %v128_v47 }
  0x1c   :  { %v211_v53 = vpack.c.bf16 %v151_v50, %v150_v49 }
  0x1d   :  { %925 = vmatmul.mubr.msk.bf16.gmra.mrb[8].mxu0 %vm232_vm1, %v209_v41  ;;  %v219_v54 = vpack.c.bf16 %v167_v52, %v166_v51 }
  0x1e   :  { %941 = vmatmul.mubr.msk.bf16.gmra.mrb[8].mxu1 %vm232_vm1, %v217_v44  ;;  %928 = vmatprep.mubr.msk.bf16.mxu0 %vm232_vm1, %v210_v45 }
  0x1f   :  { %944 = vmatprep.mubr.msk.bf16.mxu1 %vm232_vm1, %v218_v48 }
  0x25   :  { %929 = vmatmul.mubr.msk.bf16.gmra.mrb[12].mxu0 %vm232_vm1, %v211_v53 }
  0x26   :  { %945 = vmatmul.mubr.msk.bf16.gmra.mrb[12].mxu1 %vm232_vm1, %v219_v54 }
  0xe0   :  { %v918_v57 = vpop.f32.mrb[0].mxu0 }
  0xe1   :  { %v444_v60 = vadd.f32 %v918_v57, %v174_v5  ;;  %v934_v61 = vpop.f32.mrb[0].mxu1  ;;  %v315_v62 = vpop.f32.mrb[1].mxu0  ;;  %v182_v57 = vld [vmem:[#allocation2 + $0x50] sm:$0xff] }
  0xe2   :  { %v460_v8 = vadd.f32 %v934_v61, %v190_v55  ;;  %v442_v1 = vadd.f32 %v315_v62, %v172_v56  ;;  %v379_v2 = vpop.f32.mrb[1].mxu1  ;;  %v919_v3 = vpop.f32.mrb[2].mxu0  ;;  %v198_v61 = vld [vmem:[#allocation2 + $0xd0] sm:$0xff]  ;;  %v180_v62 = vld [vmem:[#allocation2 + $0x40] sm:$0xff] }
  0xe3   :  { %477 = vst.msk [vmem:[#allocation2 + $0x10] sm:$0xff] %vm25_vm0, %v444_v60  ;;  %v458_v6 = vadd.f32 %v379_v2, %v188_v58  ;;  %v445_v7 = vadd.f32 %v919_v3, %v175_v59  ;;  %v935_v9 = vpop.f32.mrb[2].mxu1  ;;  %v318_v10 = vpop.f32.mrb[3].mxu0 }
  0xe4   :  { %493 = vst.msk [vmem:[#allocation2 + $0x90] sm:$0xff] %vm25_vm0, %v460_v8  ;;  %475 = vst.msk [vmem:[#allocation2] sm:$0xff] %vm25_vm0, %v442_v1  ;;  %v461_v11 = vadd.f32 %v935_v9, %v191_v63  ;;  %v443_v12 = vadd.f32 %v318_v10, %v173_v0  ;;  %v382_v13 = vpop.f32.mrb[3].mxu1  ;;  %v196_v8 = vld [vmem:[#allocation2 + $0xc0] sm:$0xff]  ;;  %v183_v1 = vld [vmem:[#allocation2 + $0x58] sm:$0xff] }
  0xe5   :  { %491 = vst.msk [vmem:[#allocation2 + $0x80] sm:$0xff] %vm25_vm0, %v458_v6  ;;  %478 = vst.msk [vmem:[#allocation2 + $0x18] sm:$0xff] %vm25_vm0, %v445_v7  ;;  %v459_v14 = vadd.f32 %v382_v13, %v189_v4  ;;  %v199_v7 = vld [vmem:[#allocation2 + $0xd8] sm:$0xff] }
  0xe6   :  { %494 = vst.msk [vmem:[#allocation2 + $0x98] sm:$0xff] %vm25_vm0, %v461_v11  ;;  %476 = vst.msk [vmem:[#allocation2 + $0x8] sm:$0xff] %vm25_vm0, %v443_v12 }
  0xe7   :  { %492 = vst.msk [vmem:[#allocation2 + $0x88] sm:$0xff] %vm25_vm0, %v459_v14 }
  0xe8   :  { %v922_v19 = vpop.f32.mrb[4].mxu0 }
  0xe9   :  { %v448_v22 = vadd.f32 %v922_v19, %v178_v15  ;;  %v938_v23 = vpop.f32.mrb[4].mxu1  ;;  %v331_v24 = vpop.f32.mrb[5].mxu0 }
  0xea   :  { %v512_v27 = vld [vmem:[#allocation2 + $0x10] sm:$0xff]  ;;  %v464_v28 = vadd.f32 %v938_v23, %v194_v16  ;;  %v446_v29 = vadd.f32 %v331_v24, %v176_v17  ;;  %v395_v30 = vpop.f32.mrb[5].mxu1  ;;  %v923_v31 = vpop.f32.mrb[6].mxu0 }
  0xeb   :  { %v1352_v33 = vadd.f32 %v1349_v18, %v512_v27  ;;  %v528_v34 = vld [vmem:[#allocation2 + $0x90] sm:$0xff]  ;;  %v510_v35 = vld [vmem:[#allocation2] sm:$0xff]  ;;  %481 = vst.msk [vmem:[#allocation2 + $0x30] sm:$0xff] %vm25_vm0, %v448_v22  ;;  %v462_v36 = vadd.f32 %v395_v30, %v192_v20  ;;  %v449_v37 = vadd.f32 %v923_v31, %v179_v21  ;;  %v939_v38 = vpop.f32.mrb[6].mxu1  ;;  %v334_v39 = vpop.f32.mrb[7].mxu0 }
  0xec   :  { %v1356_v40 = vadd.f32 %v1349_v18, %v528_v34  ;;  %v1359_v41 = vadd.f32 %v1349_v18, %v510_v35  ;;  %v526_v42 = vld [vmem:[#allocation2 + $0x80] sm:$0xff]  ;;  %v513_v43 = vld [vmem:[#allocation2 + $0x18] sm:$0xff]  ;;  %497 = vst.msk [vmem:[#allocation2 + $0xb0] sm:$0xff] %vm25_vm0, %v464_v28  ;;  %479 = vst.msk [vmem:[#allocation2 + $0x20] sm:$0xff] %vm25_vm0, %v446_v29  ;;  %v465_v44 = vadd.f32 %v939_v38, %v195_v25  ;;  %v398_v46 = vpop.f32.mrb[7].mxu1 }
  0xed   :  { %v447_v45 = vadd.f32 %v334_v39, %v177_v26  ;;  %v864_v47 = vmul.f32 -1.442695, %v1352_v33  ;;  %v1365_v48 = vadd.f32 %v1349_v18, %v526_v42  ;;  %v1368_v49 = vadd.f32 %v1349_v18, %v513_v43  ;;  %v529_v50 = vld [vmem:[#allocation2 + $0x98] sm:$0xff]  ;;  %v511_v51 = vld [vmem:[#allocation2 + $0x8] sm:$0xff]  ;;  %495 = vst.msk [vmem:[#allocation2 + $0xa0] sm:$0xff] %vm25_vm0, %v462_v36  ;;  %482 = vst.msk [vmem:[#allocation2 + $0x38] sm:$0xff] %vm25_vm0, %v449_v37 }
  0xee   :  { %v463_v52 = vadd.f32 %v398_v46, %v193_v32  ;;  %v880_v53 = vmul.f32 -1.442695, %v1356_v40  ;;  %v862_v54 = vmul.f32 -1.442695, %v1359_v41  ;;  %v1375_v5 = vadd.f32 %v1349_v18, %v529_v50  ;;  %v527_v56 = vld [vmem:[#allocation2 + $0x88] sm:$0xff]  ;;  %498 = vst.msk [vmem:[#allocation2 + $0xb8] sm:$0xff] %vm25_vm0, %v465_v44 }
  0xef   :  { %v1378_v55 = vadd.f32 %v1349_v18, %v511_v51  ;;  %480 = vst.msk [vmem:[#allocation2 + $0x28] sm:$0xff] %vm25_vm0, %v447_v45  ;;  %955 = vpow2.f32 %v864_v47  ;;  %v878_v58 = vmul.f32 -1.442695, %v1365_v48  ;;  %v865_v59 = vmul.f32 -1.442695, %v1368_v49  ;;  %v181_v32 = vld [vmem:[#allocation2 + $0x48] sm:$0xff] }
  0xf0   :  { %v1385_v60 = vadd.f32 %v1349_v18, %v527_v56  ;;  %496 = vst.msk [vmem:[#allocation2 + $0xa8] sm:$0xff] %vm25_vm0, %v463_v52  ;;  %957 = vpow2.f32 %v880_v53  ;;  %v881_v63 = vmul.f32 -1.442695, %v1375_v5  ;;  %v926_v0 = vpop.f32.mrb[8].mxu0  ;;  %v197_v36 = vld [vmem:[#allocation2 + $0xc8] sm:$0xff]  ;;  %v186_v37 = vld [vmem:[#allocation2 + $0x70] sm:$0xff] }
  0xf1   :  { %959 = vpow2.f32 %v862_v54  ;;  %v863_v2 = vmul.f32 -1.442695, %v1378_v55  ;;  %v452_v3 = vadd.f32 %v926_v0, %v182_v57  ;;  %v942_v4 = vpop.f32.mrb[8].mxu1  ;;  %v347_v6 = vpop.f32.mrb[9].mxu0  ;;  %v202_v42 = vld [vmem:[#allocation2 + $0xf0] sm:$0xff]  ;;  %v184_v45 = vld [vmem:[#allocation2 + $0x60] sm:$0xff] }
  0xf2   :  { %961 = vpow2.f32 %v878_v58  ;;  %v879_v9 = vmul.f32 -1.442695, %v1385_v60  ;;  %v516_v10 = vld [vmem:[#allocation2 + $0x30] sm:$0xff]  ;;  %v468_v11 = vadd.f32 %v942_v4, %v198_v61  ;;  %v450_v12 = vadd.f32 %v347_v6, %v180_v62  ;;  %v411_v13 = vpop.f32.mrb[9].mxu1  ;;  %v927_v14 = vpop.f32.mrb[10].mxu0 }
  0xf3   :  { %963 = vpow2.f32 %v865_v59  ;;  %v1392_v15 = vadd.f32 %v1349_v18, %v516_v10  ;;  %v532_v16 = vld [vmem:[#allocation2 + $0xb0] sm:$0xff]  ;;  %v514_v17 = vld [vmem:[#allocation2 + $0x20] sm:$0xff]  ;;  %485 = vst.msk [vmem:[#allocation2 + $0x50] sm:$0xff] %vm25_vm0, %v452_v3  ;;  %v466_v19 = vadd.f32 %v411_v13, %v196_v8  ;;  %v453_v20 = vadd.f32 %v927_v14, %v183_v1  ;;  %v943_v21 = vpop.f32.mrb[10].mxu1  ;;  %v350_v22 = vpop.f32.mrb[11].mxu0  ;;  %v187_v13 = vld [vmem:[#allocation2 + $0x78] sm:$0xff] }
  0xf4   :  { %965 = vpow2.f32 %v881_v63  ;;  %v1396_v23 = vadd.f32 %v1349_v18, %v532_v16  ;;  %v1399_v24 = vadd.f32 %v1349_v18, %v514_v17  ;;  %v530_v25 = vld [vmem:[#allocation2 + $0xa0] sm:$0xff]  ;;  %v517_v26 = vld [vmem:[#allocation2 + $0x38] sm:$0xff]  ;;  %501 = vst.msk [vmem:[#allocation2 + $0xd0] sm:$0xff] %vm25_vm0, %v468_v11  ;;  %483 = vst.msk [vmem:[#allocation2 + $0x40] sm:$0xff] %vm25_vm0, %v450_v12  ;;  %v469_v27 = vadd.f32 %v943_v21, %v199_v7  ;;  %v414_v28 = vpop.f32.mrb[11].mxu1 }
  0xf5   :  { %967 = vpow2.f32 %v863_v2  ;;  %v868_v29 = vmul.f32 -1.442695, %v1392_v15  ;;  %v1405_v30 = vadd.f32 %v1349_v18, %v530_v25  ;;  %v1408_v31 = vadd.f32 %v1349_v18, %v517_v26  ;;  %499 = vst.msk [vmem:[#allocation2 + $0xc0] sm:$0xff] %vm25_vm0, %v466_v19  ;;  %486 = vst.msk [vmem:[#allocation2 + $0x58] sm:$0xff] %vm25_vm0, %v453_v20  ;;  %v533_v2 = vld [vmem:[#allocation2 + $0xb8] sm:$0xff]  ;;  %v200_v10 = vld [vmem:[#allocation2 + $0xe0] sm:$0xff] }
  0xf6   :  { %969 = vpow2.f32 %v879_v9  ;;  %v884_v34 = vmul.f32 -1.442695, %v1396_v23  ;;  %v866_v35 = vmul.f32 -1.442695, %v1399_v24  ;;  %502 = vst.msk [vmem:[#allocation2 + $0xd8] sm:$0xff] %vm25_vm0, %v469_v27  ;;  %v451_v43 = vadd.f32 %v350_v22, %v181_v32  ;;  %v515_v3 = vld [vmem:[#allocation2 + $0x28] sm:$0xff] }
  0xf7   :  { %971 = vpow2.f32 %v868_v29  ;;  %v882_v38 = vmul.f32 -1.442695, %v1405_v30  ;;  %v869_v39 = vmul.f32 -1.442695, %v1408_v31  ;;  %v467_v47 = vadd.f32 %v414_v28, %v197_v36  ;;  %v531_v9 = vld [vmem:[#allocation2 + $0xa8] sm:$0xff] }
  0xf8   :  { %973 = vpow2.f32 %v884_v34  ;;  %v930_v44 = vpop.f32.mrb[12].mxu0  ;;  %484 = vst.msk [vmem:[#allocation2 + $0x48] sm:$0xff] %vm25_vm0, %v451_v43  ;;  %v1429_v17 = vadd.f32 %v1349_v18, %v533_v2  ;;  %v1432_v19 = vadd.f32 %v1349_v18, %v515_v3  ;;  %v1435_v25 = vadd.f32 %v1349_v18, %v531_v9 }
  0xf9   :  { %v956_v46 = vpop.eup %955  ;;  %975 = vpow2.f32 %v866_v35  ;;  %v456_v50 = vadd.f32 %v930_v44, %v186_v37  ;;  %v946_v51 = vpop.f32.mrb[12].mxu1  ;;  %500 = vst.msk [vmem:[#allocation2 + $0xc8] sm:$0xff] %vm25_vm0, %v467_v47  ;;  %v203_v44 = vld [vmem:[#allocation2 + $0xf8] sm:$0xff] }
  0xfa   :  { %v363_v52 = vpop.f32.mrb[13].mxu0  ;;  %v958_v53 = vpop.eup %957  ;;  %v679_v54 = vadd.f32 1.0, %v956_v46  ;;  %977 = vpow2.f32 %v882_v38  ;;  %v472_v56 = vadd.f32 %v946_v51, %v202_v42  ;;  %v520_v20 = vld [vmem:[#allocation2 + $0x50] sm:$0xff]  ;;  %v885_v42 = vmul.f32 -1.442695, %v1429_v17  ;;  %v185_v51 = vld [vmem:[#allocation2 + $0x68] sm:$0xff] }
  0xfb   :  { %v427_v57 = vpop.f32.mrb[13].mxu1  ;;  %v931_v58 = vpop.f32.mrb[14].mxu0  ;;  %v695_v61 = vadd.f32 1.0, %v958_v53  ;;  %979 = vpow2.f32 %v869_v39  ;;  %489 = vst.msk [vmem:[#allocation2 + $0x70] sm:$0xff] %vm25_vm0, %v456_v50  ;;  %v454_v62 = vadd.f32 %v363_v52, %v184_v45  ;;  %v1438_v35 = vadd.f32 %v1349_v18, %v520_v20  ;;  %v536_v36 = vld [vmem:[#allocation2 + $0xd0] sm:$0xff]  ;;  %v518_v37 = vld [vmem:[#allocation2 + $0x40] sm:$0xff] }
  0xfc   :  { %v960_v59 = vpop.eup %959  ;;  %v1420_v63 = vpop.f32.mrb[14].mxu1  ;;  %981 = vrcp.f32 %v679_v54  ;;  %505 = vst.msk [vmem:[#allocation2 + $0xf0] sm:$0xff] %vm25_vm0, %v472_v56  ;;  %v470_v26 = vadd.f32 %v427_v57, %v200_v10  ;;  %v457_v29 = vadd.f32 %v931_v58, %v187_v13  ;;  %v534_v43 = vld [vmem:[#allocation2 + $0xc0] sm:$0xff]  ;;  %v867_v47 = vmul.f32 -1.442695, %v1432_v19  ;;  %v521_v57 = vld [vmem:[#allocation2 + $0x58] sm:$0xff] }
  0xfd   :  { %v1422_v0 = vpop.f32.mrb[15].mxu0  ;;  %v962_v8 = vpop.eup %961  ;;  %v677_v1 = vadd.f32 1.0, %v960_v59  ;;  %983 = vrcp.f32 %v695_v61  ;;  %487 = vst.msk [vmem:[#allocation2 + $0x60] sm:$0xff] %vm25_vm0, %v454_v62  ;;  %v883_v50 = vmul.f32 -1.442695, %v1435_v25  ;;  %v1446_v54 = vadd.f32 %v1349_v18, %v536_v36  ;;  %v201_v58 = vld [vmem:[#allocation2 + $0xe8] sm:$0xff] }
  0xfe   :  { %v1425_v4 = vpop.f32.mrb[15].mxu1  ;;  %v964_v6 = vpop.eup %963  ;;  %v693_v7 = vadd.f32 1.0, %v962_v8  ;;  %503 = vst.msk [vmem:[#allocation2 + $0xe0] sm:$0xff] %vm25_vm0, %v470_v26  ;;  %490 = vst.msk [vmem:[#allocation2 + $0x78] sm:$0xff] %vm25_vm0, %v457_v29  ;;  %v1449_v56 = vadd.f32 %v1349_v18, %v518_v37  ;;  %v872_v62 = vmul.f32 -1.442695, %v1438_v35  ;;  %v1453_v8 = vadd.f32 %v1349_v18, %v534_v43 }
  0xff   :  { %v966_v11 = vpop.eup %965  ;;  %985 = vrcp.f32 %v677_v1  ;;  %v680_v12 = vadd.f32 1.0, %v964_v6  ;;  %v537_v1 = vld [vmem:[#allocation2 + $0xd8] sm:$0xff]  ;;  %v519_v6 = vld [vmem:[#allocation2 + $0x48] sm:$0xff]  ;;  %v455_v9 = vadd.f32 %v1422_v0, %v185_v51 }
 0x100   :  { %v968_v14 = vpop.eup %967  ;;  %987 = vrcp.f32 %v693_v7  ;;  %v696_v16 = vadd.f32 1.0, %v966_v11  ;;  %v473_v7 = vadd.f32 %v1420_v63, %v203_v44  ;;  %v535_v13 = vld [vmem:[#allocation2 + $0xc8] sm:$0xff]  ;;  %v888_v63 = vmul.f32 -1.442695, %v1446_v54 }
 0x101   :  { %v970_v21 = vpop.eup %969  ;;  %989 = vrcp.f32 %v680_v12  ;;  %v678_v22 = vadd.f32 1.0, %v968_v14  ;;  %v1460_v12 = vadd.f32 %v1349_v18, %v521_v57  ;;  %v471_v14 = vadd.f32 %v1425_v4, %v201_v58  ;;  %488 = vst.msk [vmem:[#allocation2 + $0x68] sm:$0xff] %vm25_vm0, %v455_v9 }
 0x102   :  { %v972_v27 = vpop.eup %971  ;;  %991 = vrcp.f32 %v696_v16  ;;  %v694_v28 = vadd.f32 1.0, %v970_v21  ;;  %v524_v0 = vld [vmem:[#allocation2 + $0x70] sm:$0xff]  ;;  %506 = vst.msk [vmem:[#allocation2 + $0xf8] sm:$0xff] %vm25_vm0, %v473_v7  ;;  %v1481_v21 = vadd.f32 %v1349_v18, %v519_v6 }
 0x103   :  { %v974_v32 = vpop.eup %973  ;;  %993 = vrcp.f32 %v678_v22  ;;  %v683_v34 = vadd.f32 1.0, %v972_v27  ;;  %v540_v22 = vld [vmem:[#allocation2 + $0xf0] sm:$0xff]  ;;  %504 = vst.msk [vmem:[#allocation2 + $0xe8] sm:$0xff] %vm25_vm0, %v471_v14  ;;  %v1500_v36 = vadd.f32 %v1349_v18, %v524_v0 }
 0x104   :  { %v976_v38 = vpop.eup %975  ;;  %995 = vrcp.f32 %v694_v28  ;;  %v699_v39 = vadd.f32 1.0, %v974_v32  ;;  %v1491_v28 = vadd.f32 %v1349_v18, %v535_v13  ;;  %v871_v43 = vmul.f32 -1.442695, %v1481_v21  ;;  %v522_v6 = vld [vmem:[#allocation2 + $0x60] sm:$0xff] }
 0x105   :  { %v978_v45 = vpop.eup %977  ;;  %997 = vrcp.f32 %v683_v34  ;;  %v681_v46 = vadd.f32 1.0, %v976_v38  ;;  %v873_v34 = vmul.f32 -1.442695, %v1460_v12  ;;  %v525_v14 = vld [vmem:[#allocation2 + $0x78] sm:$0xff] }
 0x106   :  { %v980_v52 = vpop.eup %979  ;;  %999 = vrcp.f32 %v699_v39  ;;  %v697_v53 = vadd.f32 1.0, %v978_v45  ;;  %v1509_v39 = vadd.f32 %v1349_v18, %v540_v22  ;;  %v887_v45 = vmul.f32 -1.442695, %v1491_v28 }
 0x107   :  { %v982_v59 = vpop.eup %981  ;;  %1001 = vrcp.f32 %v681_v46  ;;  %v684_v61 = vadd.f32 1.0, %v980_v52 }
 0x108   :  { %v984_v2 = vpop.eup %983  ;;  %v775_v3 = vmul.f32 %v982_v59, %v1352_v33  ;;  %1003 = vrcp.f32 %v697_v53  ;;  %v892_v51 = vmul.f32 -1.442695, %v1509_v39  ;;  %v523_v22 = vld [vmem:[#allocation2 + $0x68] sm:$0xff] }
 0x109   :  { %v986_v10 = vpop.eup %985  ;;  %v791_v11 = vmul.f32 %v984_v2, %v1356_v40  ;;  %1005 = vrcp.f32 %v684_v61  ;;  %v1470_v40 = vadd.f32 %v1349_v18, %v537_v1  ;;  %v541_v0 = vld [vmem:[#allocation2 + $0xf8] sm:$0xff] }
 0x10a   :  { %v988_v16 = vpop.eup %987  ;;  %807 = vst.msk [vmem:[%s1677_s5 + $0x10] sm:$0xff] %vm25_vm0, %v775_v3  ;;  %v773_v33 = vmul.f32 %v986_v10, %v1359_v41  ;;  %1007 = vpow2.f32 %v885_v42  ;;  %v870_v41 = vmul.f32 -1.442695, %v1449_v56  ;;  %v538_v10 = vld [vmem:[#allocation2 + $0xe0] sm:$0xff] }
 0x10b   :  { %v990_v4 = vpop.eup %989  ;;  %823 = vst.msk [vmem:[%s1677_s5 + $0x90] sm:$0xff] %vm25_vm0, %v791_v11  ;;  %v789_v20 = vmul.f32 %v988_v16, %v1365_v48  ;;  %1009 = vpow2.f32 %v867_v47  ;;  %v886_v48 = vmul.f32 -1.442695, %v1453_v8  ;;  %v889_v38 = vmul.f32 -1.442695, %v1470_v40 }
 0x10c   :  { %v992_v26 = vpop.eup %991  ;;  %805 = vst.msk [vmem:[%s1677_s5] sm:$0xff] %vm25_vm0, %v773_v33  ;;  %v776_v27 = vmul.f32 %v990_v4, %v1368_v49  ;;  %1011 = vpow2.f32 %v883_v50  ;;  %v876_v47 = vmul.f32 -1.442695, %v1500_v36 }
 0x10d   :  { %v994_v29 = vpop.eup %993  ;;  %821 = vst.msk [vmem:[%s1677_s5 + $0x80] sm:$0xff] %vm25_vm0, %v789_v20  ;;  %v792_v32 = vmul.f32 %v992_v26, %v1375_v5  ;;  %1013 = vpow2.f32 %v872_v62 }
 0x10e   :  { %v996_v49 = vpop.eup %995  ;;  %808 = vst.msk [vmem:[%s1677_s5 + $0x18] sm:$0xff] %vm25_vm0, %v776_v27  ;;  %v774_v37 = vmul.f32 %v994_v29, %v1378_v55  ;;  %1015 = vpow2.f32 %v888_v63  ;;  %v1554_v63 = vadd.f32 %v1349_v18, %v522_v6  ;;  %v539_v29 = vld [vmem:[#allocation2 + $0xe8] sm:$0xff] }
 0x10f   :  { %v998_v5 = vpop.eup %997  ;;  %824 = vst.msk [vmem:[%s1677_s5 + $0x98] sm:$0xff] %vm25_vm0, %v792_v32  ;;  %v790_v42 = vmul.f32 %v996_v49, %v1385_v60  ;;  %1017 = vpow2.f32 %v870_v41  ;;  %v1557_v41 = vadd.f32 %v1349_v18, %v538_v10  ;;  %v1563_v49 = vadd.f32 %v1349_v18, %v541_v0 }
 0x110   :  { %v1000_v44 = vpop.eup %999  ;;  %806 = vst.msk [vmem:[%s1677_s5 + $0x8] sm:$0xff] %vm25_vm0, %v774_v37  ;;  %v779_v55 = vmul.f32 %v998_v5, %v1392_v15  ;;  %1019 = vpow2.f32 %v886_v48  ;;  %v1560_v48 = vadd.f32 %v1349_v18, %v525_v14  ;;  %v874_v5 = vmul.f32 -1.442695, %v1554_v63 }
 0x111   :  { %v1002_v46 = vpop.eup %1001  ;;  %822 = vst.msk [vmem:[%s1677_s5 + $0x88] sm:$0xff] %vm25_vm0, %v790_v42  ;;  %v795_v60 = vmul.f32 %v1000_v44, %v1396_v23  ;;  %1021 = vpow2.f32 %v873_v34  ;;  %v1567_v42 = vadd.f32 %v1349_v18, %v523_v22 }
 0x112   :  { %v1004_v50 = vpop.eup %1003  ;;  %811 = vst.msk [vmem:[%s1677_s5 + $0x30] sm:$0xff] %vm25_vm0, %v779_v55  ;;  %v777_v15 = vmul.f32 %v1002_v46, %v1399_v24  ;;  %1023 = vpow2.f32 %v889_v38  ;;  %v890_v55 = vmul.f32 -1.442695, %v1557_v41 }
 0x113   :  { %v1006_v52 = vpop.eup %1005  ;;  %827 = vst.msk [vmem:[%s1677_s5 + $0xb0] sm:$0xff] %vm25_vm0, %v795_v60  ;;  %v793_v23 = vmul.f32 %v1004_v50, %v1405_v30  ;;  %1025 = vpow2.f32 %v871_v43 }
 0x114   :  { %v1008_v53 = vpop.eup %1007  ;;  %809 = vst.msk [vmem:[%s1677_s5 + $0x20] sm:$0xff] %vm25_vm0, %v777_v15  ;;  %v780_v24 = vmul.f32 %v1006_v52, %v1408_v31  ;;  %1027 = vpow2.f32 %v887_v45  ;;  %v1571_v45 = vadd.f32 %v1349_v18, %v539_v29 }
 0x115   :  { %v1010_v57 = vpop.eup %1009  ;;  %825 = vst.msk [vmem:[%s1677_s5 + $0xa0] sm:$0xff] %vm25_vm0, %v793_v23  ;;  %v700_v58 = vadd.f32 1.0, %v1008_v53  ;;  %1029 = vpow2.f32 %v876_v47  ;;  %v877_v47 = vmul.f32 -1.442695, %v1560_v48 }
 0x116   :  { %v1012_v59 = vpop.eup %1011  ;;  %812 = vst.msk [vmem:[%s1677_s5 + $0x38] sm:$0xff] %vm25_vm0, %v780_v24  ;;  %v682_v30 = vadd.f32 1.0, %v1010_v57  ;;  %1031 = vpow2.f32 %v892_v51  ;;  %v893_v51 = vmul.f32 -1.442695, %v1563_v49  ;;  %v891_v53 = vmul.f32 -1.442695, %v1571_v45 }
 0x117   :  { %v1014_v61 = vpop.eup %1013  ;;  %1033 = vrcp.f32 %v700_v58  ;;  %v698_v31 = vadd.f32 1.0, %v1012_v59 }
 0x118   :  { %v1016_v62 = vpop.eup %1015  ;;  %1035 = vrcp.f32 %v682_v30  ;;  %v687_v1 = vadd.f32 1.0, %v1014_v61 }
 0x119   :  { %v1018_v2 = vpop.eup %1017  ;;  %1037 = vrcp.f32 %v698_v31  ;;  %v703_v3 = vadd.f32 1.0, %v1016_v62 }
 0x11a   :  { %v1020_v7 = vpop.eup %1019  ;;  %1039 = vrcp.f32 %v687_v1  ;;  %v685_v9 = vadd.f32 1.0, %v1018_v2 }
 0x11b   :  { %v1022_v11 = vpop.eup %1021  ;;  %1041 = vrcp.f32 %v703_v3  ;;  %v701_v13 = vadd.f32 1.0, %v1020_v7 }
 0x11c   :  { %v1024_v16 = vpop.eup %1023  ;;  %1043 = vrcp.f32 %v685_v9  ;;  %v688_v33 = vadd.f32 1.0, %v1022_v11 }
 0x11d   :  { %v1026_v4 = vpop.eup %1025  ;;  %1045 = vrcp.f32 %v701_v13  ;;  %v704_v20 = vadd.f32 1.0, %v1024_v16 }
 0x11e   :  { %v1028_v26 = vpop.eup %1027  ;;  %1047 = vrcp.f32 %v688_v33  ;;  %v686_v27 = vadd.f32 1.0, %v1026_v4 }
 0x11f   :  { %v1030_v32 = vpop.eup %1029  ;;  %1049 = vrcp.f32 %v704_v20  ;;  %v702_v34 = vadd.f32 1.0, %v1028_v26 }
 0x120   :  { %v1032_v37 = vpop.eup %1031  ;;  %1051 = vrcp.f32 %v686_v27  ;;  %v691_v38 = vadd.f32 1.0, %v1030_v32 }
 0x121   :  { %v1034_v43 = vpop.eup %1033  ;;  %1053 = vrcp.f32 %v702_v34  ;;  %v707_v44 = vadd.f32 1.0, %v1032_v37 }
 0x122   :  { %v1036_v46 = vpop.eup %1035  ;;  %v796_v60 = vmul.f32 %v1034_v43, %v1429_v17  ;;  %1055 = vrcp.f32 %v691_v38  ;;  %v875_v17 = vmul.f32 -1.442695, %v1567_v42 }
 0x123   :  { %v1038_v50 = vpop.eup %1037  ;;  %v778_v15 = vmul.f32 %v1036_v46, %v1432_v19  ;;  %1057 = vrcp.f32 %v707_v44 }
 0x124   :  { %v1040_v52 = vpop.eup %1039  ;;  %828 = vst.msk [vmem:[%s1677_s5 + $0xb8] sm:$0xff] %vm25_vm0, %v796_v60  ;;  %v794_v18 = vmul.f32 %v1038_v50, %v1435_v25  ;;  %1059 = vpow2.f32 %v874_v5 }
 0x125   :  { %v1042_v23 = vpop.eup %1041  ;;  %810 = vst.msk [vmem:[%s1677_s5 + $0x28] sm:$0xff] %vm25_vm0, %v778_v15  ;;  %v783_v19 = vmul.f32 %v1040_v52, %v1438_v35  ;;  %1061 = vpow2.f32 %v890_v55 }
 0x126   :  { %v1044_v24 = vpop.eup %1043  ;;  %826 = vst.msk [vmem:[%s1677_s5 + $0xa8] sm:$0xff] %vm25_vm0, %v794_v18  ;;  %v799_v25 = vmul.f32 %v1042_v23, %v1446_v54  ;;  %1063 = vpow2.f32 %v877_v47 }
 0x127   :  { %v1046_v57 = vpop.eup %1045  ;;  %815 = vst.msk [vmem:[%s1677_s5 + $0x50] sm:$0xff] %vm25_vm0, %v783_v19  ;;  %v781_v35 = vmul.f32 %v1044_v24, %v1449_v56  ;;  %1065 = vpow2.f32 %v893_v51 }
 0x128   :  { %v1048_v58 = vpop.eup %1047  ;;  %831 = vst.msk [vmem:[%s1677_s5 + $0xd0] sm:$0xff] %vm25_vm0, %v799_v25  ;;  %v797_v59 = vmul.f32 %v1046_v57, %v1453_v8  ;;  %1067 = vpow2.f32 %v875_v17 }
 0x129   :  { %v1050_v54 = vpop.eup %1049  ;;  %813 = vst.msk [vmem:[%s1677_s5 + $0x40] sm:$0xff] %vm25_vm0, %v781_v35  ;;  %v784_v30 = vmul.f32 %v1048_v58, %v1460_v12  ;;  %1069 = vpow2.f32 %v891_v53 }
 0x12a   :  { %v1052_v56 = vpop.eup %1051  ;;  %829 = vst.msk [vmem:[%s1677_s5 + $0xc0] sm:$0xff] %vm25_vm0, %v797_v59  ;;  %v800_v61 = vmul.f32 %v1050_v54, %v1470_v40 }
 0x12b   :  { %v1054_v31 = vpop.eup %1053  ;;  %816 = vst.msk [vmem:[%s1677_s5 + $0x58] sm:$0xff] %vm25_vm0, %v784_v30  ;;  %v782_v8 = vmul.f32 %v1052_v56, %v1481_v21 }
 0x12c   :  { %v1056_v62 = vpop.eup %1055  ;;  %832 = vst.msk [vmem:[%s1677_s5 + $0xd8] sm:$0xff] %vm25_vm0, %v800_v61  ;;  %v798_v12 = vmul.f32 %v1054_v31, %v1491_v28 }
 0x12d   :  { %v1058_v1 = vpop.eup %1057  ;;  %814 = vst.msk [vmem:[%s1677_s5 + $0x48] sm:$0xff] %vm25_vm0, %v782_v8  ;;  %v787_v40 = vmul.f32 %v1056_v62, %v1500_v36 }
 0x12e   :  { %v1060_v2 = vpop.eup %1059  ;;  %830 = vst.msk [vmem:[%s1677_s5 + $0xc8] sm:$0xff] %vm25_vm0, %v798_v12  ;;  %v803_v21 = vmul.f32 %v1058_v1, %v1509_v39 }
 0x12f   :  { %v1062_v3 = vpop.eup %1061  ;;  %819 = vst.msk [vmem:[%s1677_s5 + $0x70] sm:$0xff] %vm25_vm0, %v787_v40  ;;  %v689_v28 = vadd.f32 1.0, %v1060_v2 }
 0x130   :  { %v1064_v6 = vpop.eup %1063  ;;  %835 = vst.msk [vmem:[%s1677_s5 + $0xf0] sm:$0xff] %vm25_vm0, %v803_v21  ;;  %v705_v36 = vadd.f32 1.0, %v1062_v3 }
 0x131   :  { %v1066_v7 = vpop.eup %1065  ;;  %1071 = vrcp.f32 %v689_v28  ;;  %v692_v9 = vadd.f32 1.0, %v1064_v6 }
 0x132   :  { %v1068_v10 = vpop.eup %1067  ;;  %1073 = vrcp.f32 %v705_v36  ;;  %v708_v39 = vadd.f32 1.0, %v1066_v7 }
 0x133   :  { %v1070_v11 = vpop.eup %1069  ;;  %1075 = vrcp.f32 %v692_v9  ;;  %v690_v13 = vadd.f32 1.0, %v1068_v10 }
 0x134   :  { %1077 = vrcp.f32 %v708_v39  ;;  %v706_v14 = vadd.f32 1.0, %v1070_v11 }
 0x135   :  { %1079 = vrcp.f32 %v690_v13 }
 0x136   :  { %1081 = vrcp.f32 %v706_v14 }
 0x13b   :  { %v1072_v16 = vpop.eup %1071 }
 0x13c   :  { %v1074_v33 = vpop.eup %1073  ;;  %v785_v0 = vmul.f32 %v1072_v16, %v1554_v63 }
 0x13d   :  { %v1076_v4 = vpop.eup %1075  ;;  %v801_v20 = vmul.f32 %v1074_v33, %v1557_v41 }
 0x13e   :  { %v1078_v22 = vpop.eup %1077  ;;  %817 = vst.msk [vmem:[%s1677_s5 + $0x60] sm:$0xff] %vm25_vm0, %v785_v0  ;;  %v788_v26 = vmul.f32 %v1076_v4, %v1560_v48 }
 0x13f   :  { %v1080_v27 = vpop.eup %1079  ;;  %833 = vst.msk [vmem:[%s1677_s5 + $0xe0] sm:$0xff] %vm25_vm0, %v801_v20  ;;  %v804_v29 = vmul.f32 %v1078_v22, %v1563_v49 }
 0x140   :  { %v1082_v63 = vpop.eup %1081  ;;  %820 = vst.msk [vmem:[%s1677_s5 + $0x78] sm:$0xff] %vm25_vm0, %v788_v26  ;;  %v786_v41 = vmul.f32 %v1080_v27, %v1567_v42 }
 0x141   :  { %836 = vst.msk [vmem:[%s1677_s5 + $0xf8] sm:$0xff] %vm25_vm0, %v804_v29  ;;  %v802_v48 = vmul.f32 %v1082_v63, %v1571_v45 }
 0x142   :  { %818 = vst.msk [vmem:[%s1677_s5 + $0x68] sm:$0xff] %vm25_vm0, %v786_v41 }
 0x143   :  { %834 = vst.msk [vmem:[%s1677_s5 + $0xe8] sm:$0xff] %vm25_vm0, %v802_v48 }

</bundles_post_ra>
